<compile_context>
chip_gen: v7x
topology: tpu7x:2x2x1
jax: 0.10.0
libtpu: 0.0.40
codegen_flags: <defaults>
</compile_context>

<pallas_src>
import jax
import jax.numpy as jnp
from jax.experimental import pallas as pl
from jax.experimental.pallas import tpu as pltpu

IN_DIM = 28 * 28      # 784 (= 49 * 16, bf16 sublane-aligned for the w1 block)
HID = 512
OUT_DIM = 10
OUT_PAD = 128         # lane-dense output slab; real logits are [:, :10]


def _round_up(x, m):
    return ((x + m - 1) // m) * m


def _weight_spec(shape):
    """Grid-invariant (resident) block: same index every grid step, so request
    a single buffer to avoid dead double-buffer VMEM. Fall back to the default
    pipelining if this JAX build doesn't accept the pipeline_mode kwarg."""
    try:
        return pl.BlockSpec(shape, lambda i: (0, 0), pipeline_mode=pl.Buffered(1))
    except TypeError:
        return pl.BlockSpec(shape, lambda i: (0, 0))


def mlp_kernel(x_ref, w1_ref, w2_ref, b2_ref, w3_ref, b3_ref, w4_ref, b4_ref,
               o_ref):
    # Layer 1: Linear(784 -> 512, bias=False) + ReLU.
    # x arrives as raw f32 from HBM (no wrapper pad/cast pass); cast to bf16
    # here so the MXU runs its native bf16 path with f32 accumulation.
    x = x_ref[...].astype(jnp.bfloat16)
    h = jnp.dot(x, w1_ref[...], preferred_element_type=jnp.float32)
    h = jnp.maximum(h, 0.0)
    # Layer 2: Linear(512 -> 512) + ReLU (bias/ReLU kept in f32 for accuracy
    # and v5e compatibility — no bf16 VPU there).
    h = jnp.dot(h.astype(jnp.bfloat16), w2_ref[...],
                preferred_element_type=jnp.float32) + b2_ref[...]
    h = jnp.maximum(h, 0.0)
    # Layer 3: Linear(512 -> 512) + ReLU
    h = jnp.dot(h.astype(jnp.bfloat16), w3_ref[...],
                preferred_element_type=jnp.float32) + b3_ref[...]
    h = jnp.maximum(h, 0.0)
    # Layer 4: Linear(512 -> 10), padded to 128 output lanes, no activation
    out = jnp.dot(h.astype(jnp.bfloat16), w4_ref[...],
                  preferred_element_type=jnp.float32) + b4_ref[...]
    o_ref[...] = out.astype(o_ref.dtype)


def prepare_params(params):
    """One-time prep: transpose to (in, out), zero-pad the ragged output dim,
    cast matmul operands to bf16. Call once and reuse across forward calls."""
    w1, w2, b2, w3, b3, w4, b4 = params
    w1t = w1.T.astype(jnp.bfloat16)                         # (784, 512)
    w2t = w2.T.astype(jnp.bfloat16)                         # (512, 512)
    w3t = w3.T.astype(jnp.bfloat16)                         # (512, 512)
    w4t = (jnp.zeros((HID, OUT_PAD), jnp.float32)
           .at[:, :OUT_DIM].set(w4.T).astype(jnp.bfloat16)) # (512, 128)
    b2r = b2.reshape(1, HID).astype(jnp.float32)
    b3r = b3.reshape(1, HID).astype(jnp.float32)
    b4r = jnp.zeros((1, OUT_PAD), jnp.float32).at[:, :OUT_DIM].set(b4)
    return (w1t, w2t, b2r, w3t, b3r, w4t, b4r)


def basic_net_forward(x, prepared_params, *, tb=512):
    """x: (B, 1, 28, 28) float32 NCHW. Returns (B, 10) float32 logits."""
    B = x.shape[0]
    # nn.Flatten -> (B, 784), row-major like PyTorch. Reshape is free; no
    # K-padding / dtype pre-pass over x in HBM.
    x_flat = x.reshape(B, IN_DIM).astype(jnp.float32)

    # Batch tile: multiple of 16 (bf16 sublane packing). Guarantee >=2 grid
    # steps whenever the batch allows it so v7x's two TensorCores both work.
    B16 = _round_up(B, 16)
    tb_req = max(16, _round_up(tb, 16))
    if B16 >= 32:
        tb_eff = min(tb_req, _round_up(-(-B16 // 2), 16))
    else:
        tb_eff = B16
    Bp = _round_up(B16, tb_eff)
    if Bp != B:                      # only pads when B isn't tile-aligned
        x_flat = jnp.pad(x_flat, ((0, Bp - B), (0, 0)))

    w1t, w2t, b2r, w3t, b3r, w4t, b4r = prepared_params

    out_pad = pl.pallas_call(
        mlp_kernel,
        out_shape=jax.ShapeDtypeStruct((Bp, OUT_PAD), jnp.float32),
        grid_spec=pltpu.PrefetchScalarGridSpec(
            num_scalar_prefetch=0,
            grid=(Bp // tb_eff,),
            in_specs=[
                # x tile: f32, full 784 lanes (== full array dim, allowed).
                pl.BlockSpec((tb_eff, IN_DIM), lambda i: (i, 0)),
                _weight_spec((IN_DIM, HID)),    # w1t (bf16)
                _weight_spec((HID, HID)),       # w2t (bf16)
                _weight_spec((1, HID)),         # b2  (f32)
                _weight_spec((HID, HID)),       # w3t (bf16)
                _weight_spec((1, HID)),         # b3  (f32)
                _weight_spec((HID, OUT_PAD)),   # w4t (bf16, padded)
                _weight_spec((1, OUT_PAD)),     # b4  (f32, padded)
            ],
            out_specs=pl.BlockSpec((tb_eff, OUT_PAD), lambda i: (i, 0)),
        ),
        compiler_params=pltpu.CompilerParams(
            dimension_semantics=("parallel",),
            # Footprint ~10 MiB at tb=512 (<=~18 MiB at tb=1024); 32 MiB is
            # comfortable on every generation incl. v7x's 64 MiB physical VMEM.
            vmem_limit_bytes=32 * 1024 * 1024,
        ),
    )(x_flat, w1t, w2t, b2r, w3t, b3r, w4t, b4r)

    return out_pad[:B, :OUT_DIM]


def init_params(key):
    """Deterministic init with PyTorch nn.Linear shapes: W is (out, in)."""
    ks = jax.random.split(key, 7)

    def u(k, shape, fan_in):
        bound = 1.0 / (fan_in ** 0.5)
        return jax.random.uniform(k, shape, jnp.float32, -bound, bound)

    w1 = u(ks[0], (HID, IN_DIM), IN_DIM)       # Linear(784, 512, bias=False)
    w2 = u(ks[1], (HID, HID), HID)             # Linear(512, 512)
    b2 = u(ks[2], (HID,), HID)
    w3 = u(ks[3], (HID, HID), HID)             # Linear(512, 512)
    b3 = u(ks[4], (HID,), HID)
    w4 = u(ks[5], (OUT_DIM, HID), HID)         # Linear(512, 10)
    b4 = u(ks[6], (OUT_DIM,), HID)
    return (w1, w2, b2, w3, b3, w4, b4)


def reference_forward(x, params):
    """Pure-JAX f32 reference replicating the PyTorch forward."""
    w1, w2, b2, w3, b3, w4, b4 = params
    h = x.reshape(x.shape[0], -1)
    h = jnp.maximum(h @ w1.T, 0.0)
    h = jnp.maximum(h @ w2.T + b2, 0.0)
    h = jnp.maximum(h @ w3.T + b3, 0.0)
    return h @ w4.T + b4


# TODO(synk): train_on / test_on (DataLoader loop, loss, optimizer) are host-side
# training utilities, not part of the forward pass; they are not translated.

if __name__ == "__main__":
    key = jax.random.PRNGKey(0)
    kx, kp = jax.random.split(key)
    B = 8
    x = jax.random.normal(kx, (B, 1, 28, 28), dtype=jnp.float32)
    params = init_params(kp)

    prepared = prepare_params(params)          # one-time weight prep (hoisted)
    out = basic_net_forward(x, prepared)
    out = jax.block_until_ready(out)

    ref = reference_forward(x, params)
    assert out.shape == (B, OUT_DIM)
    # bf16 matmul operands (f32 accumulation) -> loosened tolerance vs f32 ref.
    assert jnp.allclose(out, ref, atol=5e-2, rtol=5e-2), "mismatch vs reference"
    print("KERNEL_OK")
</pallas_src>

<mosaic_0001>
module attributes {stable_mosaic.version = 11 : i64} {
  func.func @mlp_kernel(%arg0: i32, %arg1: memref<16x784xf32, #tpu.memory_space<vmem>>, %arg2: memref<784x512xbf16, #tpu.memory_space<vmem>>, %arg3: memref<512x512xbf16, #tpu.memory_space<vmem>>, %arg4: memref<1x512xf32, #tpu.memory_space<vmem>>, %arg5: memref<512x512xbf16, #tpu.memory_space<vmem>>, %arg6: memref<1x512xf32, #tpu.memory_space<vmem>>, %arg7: memref<512x128xbf16, #tpu.memory_space<vmem>>, %arg8: memref<1x128xf32, #tpu.memory_space<vmem>>, %arg9: memref<16x128xf32, #tpu.memory_space<vmem>>) attributes {dimension_semantics = [#tpu.dimension_semantics<parallel>], iteration_bounds = array<i64: 1>, scalar_prefetch = 0 : i64, scratch_operands = 0 : i64, tpu.core_type = #tpu.core_type<tc>, window_params = [{transform_indices = @transform_0, window_bounds = array<i64: 16, 784>}, {pipeline_mode = #tpu.pipeline_mode<synchronous>, transform_indices = @transform_1, window_bounds = array<i64: 784, 512>}, {pipeline_mode = #tpu.pipeline_mode<synchronous>, transform_indices = @transform_2, window_bounds = array<i64: 512, 512>}, {pipeline_mode = #tpu.pipeline_mode<synchronous>, transform_indices = @transform_3, window_bounds = array<i64: 1, 512>}, {pipeline_mode = #tpu.pipeline_mode<synchronous>, transform_indices = @transform_4, window_bounds = array<i64: 512, 512>}, {pipeline_mode = #tpu.pipeline_mode<synchronous>, transform_indices = @transform_5, window_bounds = array<i64: 1, 512>}, {pipeline_mode = #tpu.pipeline_mode<synchronous>, transform_indices = @transform_6, window_bounds = array<i64: 512, 128>}, {pipeline_mode = #tpu.pipeline_mode<synchronous>, transform_indices = @transform_7, window_bounds = array<i64: 1, 128>}, {transform_indices = @transform_8, window_bounds = array<i64: 16, 128>}]} {
    %c0 = arith.constant 0 : index
    %c0_0 = arith.constant 0 : index
    %0 = vector.load %arg1[%c0, %c0_0] : memref<16x784xf32, #tpu.memory_space<vmem>>, vector<16x784xf32>
    %1 = arith.truncf %0 : vector<16x784xf32> to vector<16x784xbf16>
    %c0_1 = arith.constant 0 : index
    %c0_2 = arith.constant 0 : index
    %2 = vector.load %arg2[%c0_1, %c0_2] : memref<784x512xbf16, #tpu.memory_space<vmem>>, vector<784x512xbf16>
    %cst = arith.constant dense<0.000000e+00> : vector<16x512xf32>
    %3 = tpu.matmul %1, %2, %cst {dimension_numbers = #tpu.dot_dimension_numbers<[1], [0], [0], [1], [0, 0, 1, 1], [], []>} : vector<16x784xbf16>, vector<784x512xbf16>, vector<16x512xf32> -> vector<16x512xf32>
    %cst_3 = arith.constant 0.000000e+00 : f32
    %4 = vector.broadcast %cst_3 : f32 to vector<16x512xf32>
    %5 = arith.maximumf %3, %4 : vector<16x512xf32>
    %6 = arith.truncf %5 : vector<16x512xf32> to vector<16x512xbf16>
    %c0_4 = arith.constant 0 : index
    %c0_5 = arith.constant 0 : index
    %7 = vector.load %arg3[%c0_4, %c0_5] : memref<512x512xbf16, #tpu.memory_space<vmem>>, vector<512x512xbf16>
    %cst_6 = arith.constant dense<0.000000e+00> : vector<16x512xf32>
    %8 = tpu.matmul %6, %7, %cst_6 {dimension_numbers = #tpu.dot_dimension_numbers<[1], [0], [0], [1], [0, 0, 1, 1], [], []>} : vector<16x512xbf16>, vector<512x512xbf16>, vector<16x512xf32> -> vector<16x512xf32>
    %c0_7 = arith.constant 0 : index
    %c0_8 = arith.constant 0 : index
    %9 = vector.load %arg4[%c0_7, %c0_8] : memref<1x512xf32, #tpu.memory_space<vmem>>, vector<1x512xf32>
    %10 = vector.broadcast %9 : vector<1x512xf32> to vector<16x512xf32>
    %11 = arith.addf %8, %10 : vector<16x512xf32>
    %cst_9 = arith.constant 0.000000e+00 : f32
    %12 = vector.broadcast %cst_9 : f32 to vector<16x512xf32>
    %13 = arith.maximumf %11, %12 : vector<16x512xf32>
    %14 = arith.truncf %13 : vector<16x512xf32> to vector<16x512xbf16>
    %c0_10 = arith.constant 0 : index
    %c0_11 = arith.constant 0 : index
    %15 = vector.load %arg5[%c0_10, %c0_11] : memref<512x512xbf16, #tpu.memory_space<vmem>>, vector<512x512xbf16>
    %cst_12 = arith.constant dense<0.000000e+00> : vector<16x512xf32>
    %16 = tpu.matmul %14, %15, %cst_12 {dimension_numbers = #tpu.dot_dimension_numbers<[1], [0], [0], [1], [0, 0, 1, 1], [], []>} : vector<16x512xbf16>, vector<512x512xbf16>, vector<16x512xf32> -> vector<16x512xf32>
    %c0_13 = arith.constant 0 : index
    %c0_14 = arith.constant 0 : index
    %17 = vector.load %arg6[%c0_13, %c0_14] : memref<1x512xf32, #tpu.memory_space<vmem>>, vector<1x512xf32>
    %18 = vector.broadcast %17 : vector<1x512xf32> to vector<16x512xf32>
    %19 = arith.addf %16, %18 : vector<16x512xf32>
    %cst_15 = arith.constant 0.000000e+00 : f32
    %20 = vector.broadcast %cst_15 : f32 to vector<16x512xf32>
    %21 = arith.maximumf %19, %20 : vector<16x512xf32>
    %22 = arith.truncf %21 : vector<16x512xf32> to vector<16x512xbf16>
    %c0_16 = arith.constant 0 : index
    %c0_17 = arith.constant 0 : index
    %23 = vector.load %arg7[%c0_16, %c0_17] : memref<512x128xbf16, #tpu.memory_space<vmem>>, vector<512x128xbf16>
    %cst_18 = arith.constant dense<0.000000e+00> : vector<16x128xf32>
    %24 = tpu.matmul %22, %23, %cst_18 {dimension_numbers = #tpu.dot_dimension_numbers<[1], [0], [0], [1], [0, 0, 1, 1], [], []>} : vector<16x512xbf16>, vector<512x128xbf16>, vector<16x128xf32> -> vector<16x128xf32>
    %c0_19 = arith.constant 0 : index
    %c0_20 = arith.constant 0 : index
    %25 = vector.load %arg8[%c0_19, %c0_20] : memref<1x128xf32, #tpu.memory_space<vmem>>, vector<1x128xf32>
    %26 = vector.broadcast %25 : vector<1x128xf32> to vector<16x128xf32>
    %27 = arith.addf %24, %26 : vector<16x128xf32>
    %c0_21 = arith.constant 0 : index
    %c0_22 = arith.constant 0 : index
    %28 = vector.load %arg9[%c0_21, %c0_22] : memref<16x128xf32, #tpu.memory_space<vmem>>, vector<16x128xf32>
    tpu.vector_store %arg9[%c0_21, %c0_22], %27 {strides = array<i32>} : memref<16x128xf32, #tpu.memory_space<vmem>>, vector<16x128xf32>,
    return
  }
  func.func @transform_0(%arg0: i32) -> (i32, i32) {
    %c0_i32 = arith.constant 0 : i32
    %c0_i32_0 = arith.constant 0 : i32
    return %arg0, %c0_i32 : i32, i32
  }
  func.func @transform_1(%arg0: i32) -> (i32, i32) {
    %c0_i32 = arith.constant 0 : i32
    %c0_i32_0 = arith.constant 0 : i32
    %c0_i32_1 = arith.constant 0 : i32
    return %c0_i32, %c0_i32_0 : i32, i32
  }
  func.func @transform_2(%arg0: i32) -> (i32, i32) {
    %c0_i32 = arith.constant 0 : i32
    %c0_i32_0 = arith.constant 0 : i32
    %c0_i32_1 = arith.constant 0 : i32
    return %c0_i32, %c0_i32_0 : i32, i32
  }
  func.func @transform_3(%arg0: i32) -> (i32, i32) {
    %c0_i32 = arith.constant 0 : i32
    %c0_i32_0 = arith.constant 0 : i32
    %c0_i32_1 = arith.constant 0 : i32
    return %c0_i32, %c0_i32_0 : i32, i32
  }
  func.func @transform_4(%arg0: i32) -> (i32, i32) {
    %c0_i32 = arith.constant 0 : i32
    %c0_i32_0 = arith.constant 0 : i32
    %c0_i32_1 = arith.constant 0 : i32
    return %c0_i32, %c0_i32_0 : i32, i32
  }
  func.func @transform_5(%arg0: i32) -> (i32, i32) {
    %c0_i32 = arith.constant 0 : i32
    %c0_i32_0 = arith.constant 0 : i32
    %c0_i32_1 = arith.constant 0 : i32
    return %c0_i32, %c0_i32_0 : i32, i32
  }
  func.func @transform_6(%arg0: i32) -> (i32, i32) {
    %c0_i32 = arith.constant 0 : i32
    %c0_i32_0 = arith.constant 0 : i32
    %c0_i32_1 = arith.constant 0 : i32
    return %c0_i32, %c0_i32_0 : i32, i32
  }
  func.func @transform_7(%arg0: i32) -> (i32, i32) {
    %c0_i32 = arith.constant 0 : i32
    %c0_i32_0 = arith.constant 0 : i32
    %c0_i32_1 = arith.constant 0 : i32
    return %c0_i32, %c0_i32_0 : i32, i32
  }
  func.func @transform_8(%arg0: i32) -> (i32, i32) {
    %c0_i32 = arith.constant 0 : i32
    %c0_i32_0 = arith.constant 0 : i32
    return %arg0, %c0_i32 : i32, i32
  }
}

</mosaic_0001>

<bundles_post_ra>
// kernel: tpu_custom_call.1
= control target key start
LH: loop header
LB: loop body
LE: loop exit
PB: predicated region body
PF: predicated region fallthrough
CT: control target
= control target key end

     0   :  { %13 = vsyncpa [#allocation3], 0  ;;  %s5602_s0 = inlined_call_operand.hbm [shape: f32[16,784], index: 0, kind: input, shape index: {}]   ;;  %s5603_s1 = inlined_call_operand.hbm [shape: bf16[784,512], index: 1, kind: input, shape index: {}]   ;;  %s5604_s2 = inlined_call_operand.hbm [shape: bf16[512,512], index: 2, kind: input, shape index: {}]   ;;  %s5605_s3 = inlined_call_operand.vmem [shape: f32[1,512], index: 3, kind: input, shape index: {}]   ;;  %s5606_s4 = inlined_call_operand.hbm [shape: bf16[512,512], index: 4, kind: input, shape index: {}]   ;;  %s5607_s5 = inlined_call_operand.vmem [shape: f32[1,512], index: 5, kind: input, shape index: {}]   ;;  %s5608_s6 = inlined_call_operand.hbm [shape: bf16[512,128], index: 6, kind: input, shape index: {}]   ;;  %s5609_s7 = inlined_call_operand.vmem [shape: f32[1,128], index: 7, kind: input, shape index: {}]   ;;  %s5610_s8 = inlined_call_operand.hbm [shape: f32[16,128], index: 8, kind: output, shape index: {}]  }
   0x1   :  { %14 = vsyncpa [#allocation6], 0 }
   0x2   :  { %15 = vsyncpa [#allocation9], 0 }
   0x3   :  { %16 = vsyncpa [#allocation4], 0  ;;  %s5422_s27 = smov [#allocation5]   ;;  %s5282_s9 = scalar_lea.hbm %s5603_s1, 25088 }
   0x4   :  { %s34_s28 = sshll.u32 %s5422_s27, 4  ;;  %p5283_p0 = scmp.ne.s32.totalorder %s5603_s1, %s5282_s9  ;;  %s35_s28 = int_to_ptr.vmem [resolvable:$true] %s34_s28 }
   0x5   :  { %p5286_p1 = scmp.lt.u32.totalorder %s5282_s9, %s5603_s1 }
   0x7   :  { %p5288_p2 = pnand %p5286_p1, %p5283_p0 }
   0x9   :  { %5291 = shalt.err (!%p5288_p2)
}
   0xa   :  { %s5292_s14 = scalar_lea.vmem %s35_s28, 25088  ;;  %p5297_p4 = scmp.lt.s32.totalorder %s35_s28, %s35_s28 }
   0xb   :  { %p5293_p3 = scmp.ne.s32.totalorder %s35_s28, %s5292_s14  ;;  %p5298_p5 = scmp.lt.s32.totalorder %s5292_s14, %s5292_s14 }
   0xd   :  { %p5299_p6 = por %p5298_p5, %p5297_p4 }
   0xf   :  { %p5300_p7 = pnand %p5299_p6, %p5293_p3 }
  0x11   :  { %5303 = shalt.err (!%p5300_p7)
}
  0x12   :  { %s5423_s15 = smov 256   ;;  %s5424_s16 = smov 16  }
  0x13   :  { %40 = dma.hbm_to_vmem [thread:$0]  %s5603_s1, 25088, %s35_s28, [#allocation6], %s5423_s15, %s5423_s15, %s5424_s16  }
  0x14   :  { %s5425_s19 = smov [#allocation8]   ;;  %s5426_s21 = smov [#allocation2]  }
  0x15   :  { %s60_s20 = sshll.u32 %s5425_s19, 4  ;;  %s22_s22 = sshll.u32 %s5426_s21, 4  ;;  %s61_s20 = int_to_ptr.vmem [resolvable:$true] %s60_s20  ;;  %s23_s22 = int_to_ptr.vmem [resolvable:$true] %s22_s22 }
  0x16   :  { %s5304_s25 = scalar_lea.hbm %s5606_s4, 16384 }
  0x17   :  { %p5305_p8 = scmp.ne.s32.totalorder %s5606_s4, %s5304_s25  ;;  %p5308_p9 = scmp.lt.u32.totalorder %s5304_s25, %s5606_s4 }
  0x19   :  { %p5310_p10 = pnand %p5308_p9, %p5305_p8 }
  0x1b   :  { %5313 = shalt.err (!%p5310_p10)
}
  0x1c   :  { %s5314_s1 = scalar_lea.vmem %s61_s20, 16384  ;;  %p5319_p12 = scmp.lt.s32.totalorder %s61_s20, %s61_s20 }
  0x1d   :  { %p5315_p11 = scmp.ne.s32.totalorder %s61_s20, %s5314_s1  ;;  %p5320_p13 = scmp.lt.s32.totalorder %s5314_s1, %s5314_s1 }
  0x1f   :  { %p5321_p0 = por %p5320_p13, %p5319_p12 }
  0x21   :  { %p5322_p1 = pnand %p5321_p0, %p5315_p11 }
  0x23   :  { %5325 = shalt.err (!%p5322_p1)
}
  0x24   :  { %66 = dma.hbm_to_vmem [thread:$0]  %s5606_s4, 16384, %s61_s20, [#allocation9], %s5423_s15, %s5423_s15, %s5424_s16  }
  0x25   :  { %s5326_s12 = scalar_lea.hbm %s5602_s0, 1792 }
  0x26   :  { %p5327_p2 = scmp.ne.s32.totalorder %s5602_s0, %s5326_s12  ;;  %p5330_p3 = scmp.lt.u32.totalorder %s5326_s12, %s5602_s0 }
  0x28   :  { %p5332_p4 = pnand %p5330_p3, %p5327_p2 }
  0x2a   :  { %5335 = shalt.err (!%p5332_p4)
}
  0x2b   :  { %s5336_s19 = scalar_lea.vmem %s23_s22, 1792  ;;  %p5341_p6 = scmp.lt.s32.totalorder %s23_s22, %s23_s22 }
  0x2c   :  { %p5337_p5 = scmp.ne.s32.totalorder %s23_s22, %s5336_s19  ;;  %p5342_p7 = scmp.lt.s32.totalorder %s5336_s19, %s5336_s19 }
  0x2e   :  { %p5343_p8 = por %p5342_p7, %p5341_p6 }
  0x30   :  { %p5344_p9 = pnand %p5343_p8, %p5337_p5 }
  0x32   :  { %5347 = shalt.err (!%p5344_p9)
}
  0x33   :  { %s5427_s4 = smov 896   ;;  %s5428_s20 = smov 56  }
  0x34   :  { %28 = dma.hbm_to_vmem [thread:$0]  %s5602_s0, 1792, %s23_s22, [#allocation3], %s5427_s4, %s5427_s4, %s5428_s20  }
  0x35   :  { %s5429_s24 = smov [#allocation7]   ;;  %s5430_s26 = smov [#allocation10]  }
  0x36   :  { %s46_s25 = sshll.u32 %s5429_s24, 4  ;;  %s74_s27 = sshll.u32 %s5430_s26, 4  ;;  %s47_s25 = int_to_ptr.vmem [resolvable:$true] %s46_s25  ;;  %s75_s27 = int_to_ptr.vmem [resolvable:$true] %s74_s27 }
  0x37   :  { %s5348_s1 = scalar_lea.hbm %s5604_s2, 16384 }
  0x38   :  { %p5349_p10 = scmp.ne.s32.totalorder %s5604_s2, %s5348_s1  ;;  %p5352_p11 = scmp.lt.u32.totalorder %s5348_s1, %s5604_s2 }
  0x3a   :  { %p5354_p12 = pnand %p5352_p11, %p5349_p10 }
  0x3c   :  { %5357 = shalt.err (!%p5354_p12)
}
  0x3d   :  { %s5358_s0 = scalar_lea.vmem %s47_s25, 16384  ;;  %p5363_p0 = scmp.lt.s32.totalorder %s47_s25, %s47_s25 }
  0x3e   :  { %p5359_p13 = scmp.ne.s32.totalorder %s47_s25, %s5358_s0  ;;  %p5364_p1 = scmp.lt.s32.totalorder %s5358_s0, %s5358_s0 }
  0x40   :  { %p5365_p2 = por %p5364_p1, %p5363_p0 }
  0x42   :  { %p5366_p3 = pnand %p5365_p2, %p5359_p13 }
  0x44   :  { %5369 = shalt.err (!%p5366_p3)
}
  0x45   :  { %52 = dma.hbm_to_vmem [thread:$0]  %s5604_s2, 16384, %s47_s25, [#allocation6], %s5423_s15, %s5423_s15, %s5424_s16  }
  0x46   :  { %s5370_s17 = scalar_lea.hbm %s5608_s6, 4096 }
  0x47   :  { %p5371_p4 = scmp.ne.s32.totalorder %s5608_s6, %s5370_s17  ;;  %p5374_p5 = scmp.lt.u32.totalorder %s5370_s17, %s5608_s6 }
  0x49   :  { %p5376_p6 = pnand %p5374_p5, %p5371_p4 }
  0x4b   :  { %5379 = shalt.err (!%p5376_p6)
}
  0x4c   :  { %s5380_s21 = scalar_lea.vmem %s75_s27, 4096  ;;  %p5385_p8 = scmp.lt.s32.totalorder %s75_s27, %s75_s27 }
  0x4d   :  { %p5381_p7 = scmp.ne.s32.totalorder %s75_s27, %s5380_s21  ;;  %p5386_p9 = scmp.lt.s32.totalorder %s5380_s21, %s5380_s21 }
  0x4f   :  { %p5387_p10 = por %p5386_p9, %p5385_p8 }
  0x51   :  { %p5388_p11 = pnand %p5387_p10, %p5381_p7 }
  0x53   :  { %5391 = shalt.err (!%p5388_p11)
}
  0x54   :  { %s5431_s2 = smov 64   ;;  %s5432_s15 = smov 4  }
  0x55   :  { %80 = dma.hbm_to_vmem [thread:$0]  %s5608_s6, 4096, %s75_s27, [#allocation9], %s5431_s2, %s5431_s2, %s5432_s15  }
  0x56   :  { %5414 = dma.done.wait [#allocation3], 1792  }
  0x57   :  { %5415 = vsyncadd [#allocation3], 4294965504 }
  0x58   :  { %5416 = dma.done.wait [#allocation6], 41472  }
  0x59   :  { %5417 = vsyncadd [#allocation6], 4294925824 }
  0x5a   :  { %5418 = dma.done.wait [#allocation9], 20480  }
  0x5b   :  { %5419 = vsyncadd [#allocation9], 4294946816  ;;  %v4572_v0 = vld [vmem:[#allocation5 + $0x4] ss:$16 sps:$4 sm:$0xff]   ;;  %v4574_v1 = vld [vmem:[#allocation5 + $0xc] ss:$16 sps:$4 sm:$0xff]  }
  0x5c   :  { %1300 = vmatprep.subr.bf16.mxu0 %v4572_v0  ;;  %v4576_v2 = vld [vmem:[#allocation5] ss:$16 sps:$4 sm:$0xff]   ;;  %v4577_v3 = vld [vmem:[#allocation5 + $0x8] ss:$16 sps:$4 sm:$0xff]   ;;  %1472 = vmatprep.subr.bf16.mxu1 %v4574_v1  ;;  %v4578_v4 = vld [vmem:[#allocation5 + $0x24] ss:$16 sps:$4 sm:$0xff]  }
  0x5d   :  { %1301 = vmatpush1.bf16.msra.mxu0 %v4576_v2  ;;  %1473 = vmatpush1.bf16.msra.mxu1 %v4577_v3  ;;  %v4580_v5 = vld [vmem:[#allocation5 + $0x2c] ss:$16 sps:$4 sm:$0xff]   ;;  %v4582_v6 = vld [vmem:[#allocation5 + $0x20] ss:$16 sps:$4 sm:$0xff]   ;;  %v4583_v7 = vld [vmem:[#allocation5 + $0x28] ss:$16 sps:$4 sm:$0xff]  }
  0x5e   :  { %1302 = vmatprep.subr.bf16.mxu0 %v4578_v4  ;;  %1474 = vmatprep.subr.bf16.mxu1 %v4580_v5  ;;  %v4584_v8 = vld [vmem:[#allocation5 + $0x44] ss:$16 sps:$4 sm:$0xff]   ;;  %v4586_v9 = vld [vmem:[#allocation5 + $0x4c] ss:$16 sps:$4 sm:$0xff]   ;;  %v4588_v10 = vld [vmem:[#allocation5 + $0x40] ss:$16 sps:$4 sm:$0xff]  }
  0x5f   :  { %v4589_v11 = vld [vmem:[#allocation5 + $0x48] ss:$16 sps:$4 sm:$0xff]   ;;  %v4590_v12 = vld [vmem:[#allocation5 + $0x64] ss:$16 sps:$4 sm:$0xff]   ;;  %v4592_v13 = vld [vmem:[#allocation5 + $0x6c] ss:$16 sps:$4 sm:$0xff]  }
  0x60   :  { %v4594_v14 = vld [vmem:[#allocation5 + $0x60] ss:$16 sps:$4 sm:$0xff]   ;;  %v4595_v15 = vld [vmem:[#allocation5 + $0x68] ss:$16 sps:$4 sm:$0xff]   ;;  %v4596_v16 = vld [vmem:[#allocation5 + $0x84] ss:$16 sps:$4 sm:$0xff]  }
  0x61   :  { %1303 = vmatpush1.bf16.msra.mxu0 %v4582_v6  ;;  %1475 = vmatpush1.bf16.msra.mxu1 %v4583_v7  ;;  %v4598_v17 = vld [vmem:[#allocation5 + $0x8c] ss:$16 sps:$4 sm:$0xff]   ;;  %v4600_v18 = vld [vmem:[#allocation5 + $0x80] ss:$16 sps:$4 sm:$0xff]   ;;  %v4601_v19 = vld [vmem:[#allocation5 + $0x88] ss:$16 sps:$4 sm:$0xff]  }
  0x62   :  { %1304 = vmatprep.subr.bf16.mxu0 %v4584_v8  ;;  %1476 = vmatprep.subr.bf16.mxu1 %v4586_v9  ;;  %v4602_v20 = vld [vmem:[#allocation5 + $0xa4] ss:$16 sps:$4 sm:$0xff]   ;;  %v4604_v21 = vld [vmem:[#allocation5 + $0xac] ss:$16 sps:$4 sm:$0xff]   ;;  %v4606_v22 = vld [vmem:[#allocation5 + $0xa0] ss:$16 sps:$4 sm:$0xff]  }
  0x63   :  { %v4607_v23 = vld [vmem:[#allocation5 + $0xa8] ss:$16 sps:$4 sm:$0xff]   ;;  %v4608_v24 = vld [vmem:[#allocation5 + $0xc4] ss:$16 sps:$4 sm:$0xff]   ;;  %v4610_v25 = vld [vmem:[#allocation5 + $0xcc] ss:$16 sps:$4 sm:$0xff]  }
  0x64   :  { %v4612_v26 = vld [vmem:[#allocation5 + $0xc0] ss:$16 sps:$4 sm:$0xff]   ;;  %v4613_v27 = vld [vmem:[#allocation5 + $0xc8] ss:$16 sps:$4 sm:$0xff]   ;;  %v4614_v28 = vld [vmem:[#allocation5 + $0xe4] ss:$16 sps:$4 sm:$0xff]  }
  0x65   :  { %1305 = vmatpush1.bf16.msra.mxu0 %v4588_v10  ;;  %1477 = vmatpush1.bf16.msra.mxu1 %v4589_v11  ;;  %v4616_v29 = vld [vmem:[#allocation5 + $0xec] ss:$16 sps:$4 sm:$0xff]   ;;  %v4618_v30 = vld [vmem:[#allocation5 + $0xe0] ss:$16 sps:$4 sm:$0xff]   ;;  %v4619_v31 = vld [vmem:[#allocation5 + $0xe8] ss:$16 sps:$4 sm:$0xff]  }
  0x66   :  { %1306 = vmatprep.subr.bf16.mxu0 %v4590_v12  ;;  %1478 = vmatprep.subr.bf16.mxu1 %v4592_v13  ;;  %v4620_v32 = vld [vmem:[#allocation5 + $0x104] ss:$16 sps:$4 sm:$0xff]   ;;  %v4622_v33 = vld [vmem:[#allocation5 + $0x10c] ss:$16 sps:$4 sm:$0xff]   ;;  %v4624_v34 = vld [vmem:[#allocation5 + $0x100] ss:$16 sps:$4 sm:$0xff]  }
  0x67   :  { %v4625_v35 = vld [vmem:[#allocation5 + $0x108] ss:$16 sps:$4 sm:$0xff]   ;;  %v4626_v36 = vld [vmem:[#allocation5 + $0x124] ss:$16 sps:$4 sm:$0xff]   ;;  %v4628_v37 = vld [vmem:[#allocation5 + $0x12c] ss:$16 sps:$4 sm:$0xff]  }
  0x68   :  { %v4630_v38 = vld [vmem:[#allocation5 + $0x120] ss:$16 sps:$4 sm:$0xff]   ;;  %v4631_v39 = vld [vmem:[#allocation5 + $0x128] ss:$16 sps:$4 sm:$0xff]   ;;  %v4632_v40 = vld [vmem:[#allocation5 + $0x144] ss:$16 sps:$4 sm:$0xff]  }
  0x69   :  { %1307 = vmatpush1.bf16.msra.mxu0 %v4594_v14  ;;  %1479 = vmatpush1.bf16.msra.mxu1 %v4595_v15  ;;  %v4634_v41 = vld [vmem:[#allocation5 + $0x14c] ss:$16 sps:$4 sm:$0xff]   ;;  %v4636_v42 = vld [vmem:[#allocation5 + $0x140] ss:$16 sps:$4 sm:$0xff]   ;;  %v4637_v43 = vld [vmem:[#allocation5 + $0x148] ss:$16 sps:$4 sm:$0xff]  }
  0x6a   :  { %1308 = vmatprep.subr.bf16.mxu0 %v4596_v16  ;;  %1480 = vmatprep.subr.bf16.mxu1 %v4598_v17  ;;  %v4638_v44 = vld [vmem:[#allocation5 + $0x164] ss:$16 sps:$4 sm:$0xff]   ;;  %v4640_v45 = vld [vmem:[#allocation5 + $0x16c] ss:$16 sps:$4 sm:$0xff]   ;;  %v4642_v48 = vld [vmem:[#allocation5 + $0x160] ss:$16 sps:$4 sm:$0xff]  }
  0x6b   :  { %v100_v46 = vld [vmem:[#allocation2 + $0x8] sm:$0xff]  ;;  %v107_v47 = vld [vmem:[#allocation2 + $0x40] sm:$0xff]  ;;  %v106_v5 = vld [vmem:[#allocation2 + $0x38] sm:$0xff]  ;;  %vm1296_vm0 = vcmask 130048   ;;  %s5434_s27 = smov [#allocation11]  }
  0x6c   :  { %v4643_v49 = vld [vmem:[#allocation5 + $0x168] ss:$16 sps:$4 sm:$0xff]   ;;  %v114_v50 = vpack.c.bf16 %v107_v47, %v100_v46  ;;  %v4644_v51 = vld [vmem:[#allocation5 + $0x184] ss:$16 sps:$4 sm:$0xff]   ;;  %v4646_v52 = vld [vmem:[#allocation5 + $0x18c] ss:$16 sps:$4 sm:$0xff]  }
  0x6d   :  { %1309 = vmatpush1.bf16.msra.mxu0 %v4600_v18  ;;  %1481 = vmatpush1.bf16.msra.mxu1 %v4601_v19  ;;  %v4648_v53 = vld [vmem:[#allocation5 + $0x180] ss:$16 sps:$4 sm:$0xff]   ;;  %v4649_v54 = vld [vmem:[#allocation5 + $0x188] ss:$16 sps:$4 sm:$0xff]   ;;  %v4650_v55 = vld [vmem:[#allocation5 + $0x1a4] ss:$16 sps:$4 sm:$0xff]  }
  0x6e   :  { %1310 = vmatprep.subr.bf16.mxu0 %v4602_v20  ;;  %1482 = vmatprep.subr.bf16.mxu1 %v4604_v21  ;;  %v4652_v56 = vld [vmem:[#allocation5 + $0x1ac] ss:$16 sps:$4 sm:$0xff]   ;;  %v4654_v57 = vld [vmem:[#allocation5 + $0x1a0] ss:$16 sps:$4 sm:$0xff]   ;;  %v4655_v58 = vld [vmem:[#allocation5 + $0x1a8] ss:$16 sps:$4 sm:$0xff]  }
  0x6f   :  { %1332 = vmatprep.mubr.bf16.mxu0 %v114_v50  ;;  %1504 = vmatprep.mubr.bf16.mxu1 %v114_v50  ;;  %v4656_v59 = vld [vmem:[#allocation5 + $0x1c4] ss:$16 sps:$4 sm:$0xff]   ;;  %v4658_v60 = vld [vmem:[#allocation5 + $0x1cc] ss:$16 sps:$4 sm:$0xff]   ;;  %v4660_v61 = vld [vmem:[#allocation5 + $0x1c0] ss:$16 sps:$4 sm:$0xff]  }
  0x70   :  { %v4661_v62 = vld [vmem:[#allocation5 + $0x1c8] ss:$16 sps:$4 sm:$0xff]   ;;  %v4662_v63 = vld [vmem:[#allocation5 + $0x1e4] ss:$16 sps:$4 sm:$0xff]   ;;  %v4664_v0 = vld [vmem:[#allocation5 + $0x1ec] ss:$16 sps:$4 sm:$0xff]  }
  0x71   :  { %1311 = vmatpush1.bf16.msra.mxu0 %v4606_v22  ;;  %1483 = vmatpush1.bf16.msra.mxu1 %v4607_v23  ;;  %v4666_v1 = vld [vmem:[#allocation5 + $0x1e0] ss:$16 sps:$4 sm:$0xff]   ;;  %v4667_v2 = vld [vmem:[#allocation5 + $0x1e8] ss:$16 sps:$4 sm:$0xff]   ;;  %v4670_v3 = vld [vmem:[#allocation5 + $0x204] ss:$16 sps:$4 sm:$0xff]  }
  0x72   :  { %1312 = vmatprep.subr.bf16.mxu0 %v4608_v24  ;;  %1484 = vmatprep.subr.bf16.mxu1 %v4610_v25  ;;  %v99_v4 = vld [vmem:[#allocation2] sm:$0xff]  ;;  %v4673_v6 = vld [vmem:[#allocation5 + $0x20c] ss:$16 sps:$4 sm:$0xff]   ;;  %v4671_v8 = vld [vmem:[#allocation5 + $0x208] ss:$16 sps:$4 sm:$0xff]   ;;  %s3956_s29 = sshll.u32 %s5434_s27, 4  ;;  %s3957_s29 = int_to_ptr.vmem [resolvable:$true] %s3956_s29 }
  0x73   :  { %v4668_v7 = vld [vmem:[#allocation5 + $0x200] ss:$16 sps:$4 sm:$0xff]   ;;  %v113_v9 = vpack.c.bf16 %v106_v5, %v99_v4  ;;  %v4676_v10 = vld [vmem:[#allocation5 + $0x224] ss:$16 sps:$4 sm:$0xff]   ;;  %v4679_v11 = vld [vmem:[#allocation5 + $0x22c] ss:$16 sps:$4 sm:$0xff]   ;;  %p5397_p13 = scmp.lt.s32.totalorder %s3957_s29, %s3957_s29 }
  0x74   :  { %v4674_v12 = vld [vmem:[#allocation5 + $0x220] ss:$16 sps:$4 sm:$0xff]   ;;  %v4677_v13 = vld [vmem:[#allocation5 + $0x228] ss:$16 sps:$4 sm:$0xff]   ;;  %v4682_v14 = vld [vmem:[#allocation5 + $0x244] ss:$16 sps:$4 sm:$0xff]  }
  0x75   :  { %1313 = vmatpush1.bf16.msra.mxu0 %v4612_v26  ;;  %1485 = vmatpush1.bf16.msra.mxu1 %v4613_v27  ;;  %v4685_v15 = vld [vmem:[#allocation5 + $0x24c] ss:$16 sps:$4 sm:$0xff]   ;;  %v4680_v16 = vld [vmem:[#allocation5 + $0x240] ss:$16 sps:$4 sm:$0xff]   ;;  %v4683_v17 = vld [vmem:[#allocation5 + $0x248] ss:$16 sps:$4 sm:$0xff]  }
  0x76   :  { %1314 = vmatprep.subr.bf16.mxu0 %v4614_v28  ;;  %1486 = vmatprep.subr.bf16.mxu1 %v4616_v29  ;;  %v4688_v18 = vld [vmem:[#allocation5 + $0x264] ss:$16 sps:$4 sm:$0xff]   ;;  %v4691_v19 = vld [vmem:[#allocation5 + $0x26c] ss:$16 sps:$4 sm:$0xff]   ;;  %v4686_v20 = vld [vmem:[#allocation5 + $0x260] ss:$16 sps:$4 sm:$0xff]  }
  0x77   :  { %v4689_v21 = vld [vmem:[#allocation5 + $0x268] ss:$16 sps:$4 sm:$0xff]   ;;  %v4694_v22 = vld [vmem:[#allocation5 + $0x284] ss:$16 sps:$4 sm:$0xff]   ;;  %v4697_v23 = vld [vmem:[#allocation5 + $0x28c] ss:$16 sps:$4 sm:$0xff]  }
  0x78   :  { %v4692_v24 = vld [vmem:[#allocation5 + $0x280] ss:$16 sps:$4 sm:$0xff]   ;;  %v4695_v25 = vld [vmem:[#allocation5 + $0x288] ss:$16 sps:$4 sm:$0xff]   ;;  %v4700_v26 = vld [vmem:[#allocation5 + $0x2a4] ss:$16 sps:$4 sm:$0xff]  }
  0x79   :  { %1315 = vmatpush1.bf16.msra.mxu0 %v4618_v30  ;;  %1487 = vmatpush1.bf16.msra.mxu1 %v4619_v31  ;;  %v4703_v27 = vld [vmem:[#allocation5 + $0x2ac] ss:$16 sps:$4 sm:$0xff]   ;;  %v4698_v28 = vld [vmem:[#allocation5 + $0x2a0] ss:$16 sps:$4 sm:$0xff]   ;;  %v4701_v29 = vld [vmem:[#allocation5 + $0x2a8] ss:$16 sps:$4 sm:$0xff]  }
  0x7a   :  { %1316 = vmatprep.subr.bf16.mxu0 %v4620_v32  ;;  %1488 = vmatprep.subr.bf16.mxu1 %v4622_v33  ;;  %v4706_v30 = vld [vmem:[#allocation5 + $0x2c4] ss:$16 sps:$4 sm:$0xff]   ;;  %v4709_v31 = vld [vmem:[#allocation5 + $0x2cc] ss:$16 sps:$4 sm:$0xff]   ;;  %v4722_v47 = vld [vmem:[#allocation5 + $0x320] ss:$16 sps:$4 sm:$0xff]  }
  0x7b   :  { %v102_v32 = vld [vmem:[#allocation2 + $0x18] sm:$0xff]  ;;  %v109_v33 = vld [vmem:[#allocation2 + $0x50] sm:$0xff] }
  0x7c   :  { %v4727_v46 = vld [vmem:[#allocation5 + $0x32c] ss:$16 sps:$4 sm:$0xff]   ;;  %v4755_v4 = vld [vmem:[#allocation5 + $0x3c8] ss:$16 sps:$4 sm:$0xff]   ;;  %v4760_v5 = vld [vmem:[#allocation5 + $0x3e4] ss:$16 sps:$4 sm:$0xff]  }
  0x7d   :  { %1317 = vmatpush1.bf16.msra.mxu0 %v4624_v34  ;;  %1489 = vmatpush1.bf16.msra.mxu1 %v4625_v35  ;;  %v4704_v34 = vld [vmem:[#allocation5 + $0x2c0] ss:$16 sps:$4 sm:$0xff]   ;;  %v4707_v35 = vld [vmem:[#allocation5 + $0x2c8] ss:$16 sps:$4 sm:$0xff]   ;;  %v4733_v50 = vld [vmem:[#allocation5 + $0x34c] ss:$16 sps:$4 sm:$0xff]  }
  0x7e   :  { %1318 = vmatprep.subr.bf16.mxu0 %v4626_v36  ;;  %1490 = vmatprep.subr.bf16.mxu1 %v4628_v37  ;;  %v116_v36 = vpack.c.bf16 %v109_v33, %v102_v32  ;;  %v4712_v37 = vld [vmem:[#allocation5 + $0x2e4] ss:$16 sps:$4 sm:$0xff]   ;;  %v4793_v32 = vld [vmem:[#allocation5 + $0x48c] ss:$16 sps:$4 sm:$0xff]   ;;  %v4788_v33 = vld [vmem:[#allocation5 + $0x480] ss:$16 sps:$4 sm:$0xff]  }
  0x81   :  { %1319 = vmatpush1.bf16.msra.mxu0 %v4630_v38  ;;  %1491 = vmatpush1.bf16.msra.mxu1 %v4631_v39  ;;  %v4715_v38 = vld [vmem:[#allocation5 + $0x2ec] ss:$16 sps:$4 sm:$0xff]   ;;  %v4710_v39 = vld [vmem:[#allocation5 + $0x2e0] ss:$16 sps:$4 sm:$0xff]  }
  0x82   :  { %1320 = vmatprep.subr.bf16.mxu0 %v4632_v40  ;;  %1492 = vmatprep.subr.bf16.mxu1 %v4634_v41  ;;  %v4713_v40 = vld [vmem:[#allocation5 + $0x2e8] ss:$16 sps:$4 sm:$0xff]   ;;  %v4718_v41 = vld [vmem:[#allocation5 + $0x304] ss:$16 sps:$4 sm:$0xff]  }
  0x85   :  { %1321 = vmatpush1.bf16.msra.mxu0 %v4636_v42  ;;  %1493 = vmatpush1.bf16.msra.mxu1 %v4637_v43  ;;  %v4721_v42 = vld [vmem:[#allocation5 + $0x30c] ss:$16 sps:$4 sm:$0xff]   ;;  %v4716_v43 = vld [vmem:[#allocation5 + $0x300] ss:$16 sps:$4 sm:$0xff]  }
  0x86   :  { %1322 = vmatprep.subr.bf16.mxu0 %v4638_v44  ;;  %1494 = vmatprep.subr.bf16.mxu1 %v4640_v45  ;;  %v4719_v44 = vld [vmem:[#allocation5 + $0x308] ss:$16 sps:$4 sm:$0xff]   ;;  %v4724_v45 = vld [vmem:[#allocation5 + $0x324] ss:$16 sps:$4 sm:$0xff]  }
  0x89   :  { %1323 = vmatpush1.bf16.msra.mxu0 %v4642_v48  ;;  %1495 = vmatpush1.bf16.msra.mxu1 %v4643_v49  ;;  %v4725_v48 = vld [vmem:[#allocation5 + $0x328] ss:$16 sps:$4 sm:$0xff]   ;;  %v4730_v49 = vld [vmem:[#allocation5 + $0x344] ss:$16 sps:$4 sm:$0xff]  }
  0x8a   :  { %1324 = vmatprep.subr.bf16.mxu0 %v4644_v51  ;;  %1496 = vmatprep.subr.bf16.mxu1 %v4646_v52  ;;  %v4728_v51 = vld [vmem:[#allocation5 + $0x340] ss:$16 sps:$4 sm:$0xff]   ;;  %v4731_v52 = vld [vmem:[#allocation5 + $0x348] ss:$16 sps:$4 sm:$0xff]  }
  0x8d   :  { %1325 = vmatpush1.bf16.msra.mxu0 %v4648_v53  ;;  %1497 = vmatpush1.bf16.msra.mxu1 %v4649_v54  ;;  %v4736_v53 = vld [vmem:[#allocation5 + $0x364] ss:$16 sps:$4 sm:$0xff]   ;;  %v4739_v54 = vld [vmem:[#allocation5 + $0x36c] ss:$16 sps:$4 sm:$0xff]  }
  0x8e   :  { %1326 = vmatprep.subr.bf16.mxu0 %v4650_v55  ;;  %1498 = vmatprep.subr.bf16.mxu1 %v4652_v56  ;;  %v4734_v55 = vld [vmem:[#allocation5 + $0x360] ss:$16 sps:$4 sm:$0xff]   ;;  %v4737_v56 = vld [vmem:[#allocation5 + $0x368] ss:$16 sps:$4 sm:$0xff]  }
  0x91   :  { %1327 = vmatpush1.bf16.msra.mxu0 %v4654_v57  ;;  %1499 = vmatpush1.bf16.msra.mxu1 %v4655_v58  ;;  %v4742_v57 = vld [vmem:[#allocation5 + $0x384] ss:$16 sps:$4 sm:$0xff]   ;;  %v4745_v58 = vld [vmem:[#allocation5 + $0x38c] ss:$16 sps:$4 sm:$0xff]  }
  0x92   :  { %1328 = vmatprep.subr.bf16.mxu0 %v4656_v59  ;;  %1500 = vmatprep.subr.bf16.mxu1 %v4658_v60  ;;  %v4740_v59 = vld [vmem:[#allocation5 + $0x380] ss:$16 sps:$4 sm:$0xff]   ;;  %v4743_v60 = vld [vmem:[#allocation5 + $0x388] ss:$16 sps:$4 sm:$0xff]  }
  0x95   :  { %1329 = vmatpush1.bf16.msra.mxu0 %v4660_v61  ;;  %1501 = vmatpush1.bf16.msra.mxu1 %v4661_v62  ;;  %v4748_v61 = vld [vmem:[#allocation5 + $0x3a4] ss:$16 sps:$4 sm:$0xff]   ;;  %v4751_v62 = vld [vmem:[#allocation5 + $0x3ac] ss:$16 sps:$4 sm:$0xff]  }
  0x96   :  { %1330 = vmatprep.subr.bf16.mxu0 %v4662_v63  ;;  %1502 = vmatprep.subr.bf16.mxu1 %v4664_v0  ;;  %v4746_v63 = vld [vmem:[#allocation5 + $0x3a0] ss:$16 sps:$4 sm:$0xff]   ;;  %v4749_v0 = vld [vmem:[#allocation5 + $0x3a8] ss:$16 sps:$4 sm:$0xff]  }
  0x99   :  { %1331 = vmatpush1.bf16.msra.mxu0 %v4666_v1  ;;  %1503 = vmatpush1.bf16.msra.mxu1 %v4667_v2  ;;  %v4754_v1 = vld [vmem:[#allocation5 + $0x3c4] ss:$16 sps:$4 sm:$0xff]   ;;  %v4757_v2 = vld [vmem:[#allocation5 + $0x3cc] ss:$16 sps:$4 sm:$0xff]  }
  0x9a   :  { %1343 = vmatprep.subr.bf16.mxu0 %v4670_v3  ;;  %1515 = vmatprep.subr.bf16.mxu1 %v4673_v6  ;;  %v4752_v3 = vld [vmem:[#allocation5 + $0x3c0] ss:$16 sps:$4 sm:$0xff]   ;;  %v4763_v6 = vld [vmem:[#allocation5 + $0x3ec] ss:$16 sps:$4 sm:$0xff]  }
  0x9c   :  { %1333 = vmatmul.mubr.bf16.vlgmr.msra.gmra.mrb[0].mxu0 %v113_v9  ;;  %1505 = vmatmul.mubr.bf16.vlgmr.msra.gmra.mrb[0].mxu1 %v113_v9  ;;  %v4766_v9 = vld [vmem:[#allocation5 + $0x404] ss:$16 sps:$4 sm:$0xff]  }
  0x9d   :  { %1344 = vmatpush1.bf16.msra.mxu0 %v4668_v7  ;;  %1516 = vmatpush1.bf16.msra.mxu1 %v4671_v8  ;;  %v4758_v7 = vld [vmem:[#allocation5 + $0x3e0] ss:$16 sps:$4 sm:$0xff]   ;;  %v4761_v8 = vld [vmem:[#allocation5 + $0x3e8] ss:$16 sps:$4 sm:$0xff]  }
  0x9e   :  { %1345 = vmatprep.subr.bf16.mxu0 %v4676_v10  ;;  %1517 = vmatprep.subr.bf16.mxu1 %v4679_v11  ;;  %v101_v10 = vld [vmem:[#allocation2 + $0x10] sm:$0xff]  ;;  %v108_v11 = vld [vmem:[#allocation2 + $0x48] sm:$0xff] }
  0x9f   :  { %1375 = vmatprep.mubr.bf16.mxu0 %v116_v36  ;;  %1547 = vmatprep.mubr.bf16.mxu1 %v116_v36  ;;  %v4799_v36 = vld [vmem:[#allocation5 + $0x4ac] ss:$16 sps:$4 sm:$0xff]  }
  0xa1   :  { %1346 = vmatpush1.bf16.msra.mxu0 %v4674_v12  ;;  %1518 = vmatpush1.bf16.msra.mxu1 %v4677_v13  ;;  %v4769_v12 = vld [vmem:[#allocation5 + $0x40c] ss:$16 sps:$4 sm:$0xff]   ;;  %v4764_v13 = vld [vmem:[#allocation5 + $0x400] ss:$16 sps:$4 sm:$0xff]  }
  0xa2   :  { %1347 = vmatprep.subr.bf16.mxu0 %v4682_v14  ;;  %1519 = vmatprep.subr.bf16.mxu1 %v4685_v15  ;;  %v4767_v14 = vld [vmem:[#allocation5 + $0x408] ss:$16 sps:$4 sm:$0xff]   ;;  %v115_v15 = vpack.c.bf16 %v108_v11, %v101_v10  ;;  %v4856_v11 = vld [vmem:[#allocation5 + $0x5e4] ss:$16 sps:$4 sm:$0xff]  }
  0xa3   :  { %v4851_v10 = vld [vmem:[#allocation5 + $0x5c8] ss:$16 sps:$4 sm:$0xff]  }
  0xa5   :  { %1348 = vmatpush1.bf16.msra.mxu0 %v4680_v16  ;;  %1520 = vmatpush1.bf16.msra.mxu1 %v4683_v17  ;;  %v4772_v16 = vld [vmem:[#allocation5 + $0x424] ss:$16 sps:$4 sm:$0xff]   ;;  %v4775_v17 = vld [vmem:[#allocation5 + $0x42c] ss:$16 sps:$4 sm:$0xff]  }
  0xa6   :  { %1349 = vmatprep.subr.bf16.mxu0 %v4688_v18  ;;  %1521 = vmatprep.subr.bf16.mxu1 %v4691_v19  ;;  %v104_v18 = vld [vmem:[#allocation2 + $0x28] sm:$0xff]  ;;  %v4770_v19 = vld [vmem:[#allocation5 + $0x420] ss:$16 sps:$4 sm:$0xff]  }
  0xa9   :  { %1350 = vmatpush1.bf16.msra.mxu0 %v4686_v20  ;;  %1522 = vmatpush1.bf16.msra.mxu1 %v4689_v21  ;;  %v4773_v20 = vld [vmem:[#allocation5 + $0x428] ss:$16 sps:$4 sm:$0xff]   ;;  %v111_v21 = vld [vmem:[#allocation2 + $0x60] sm:$0xff] }
  0xaa   :  { %1351 = vmatprep.subr.bf16.mxu0 %v4694_v22  ;;  %1523 = vmatprep.subr.bf16.mxu1 %v4697_v23  ;;  %v4778_v22 = vld [vmem:[#allocation5 + $0x444] ss:$16 sps:$4 sm:$0xff]   ;;  %v118_v23 = vpack.c.bf16 %v111_v21, %v104_v18  ;;  %v4865_v18 = vld [vmem:[#allocation5 + $0x60c] ss:$16 sps:$4 sm:$0xff]  }
  0xad   :  { %1352 = vmatpush1.bf16.msra.mxu0 %v4692_v24  ;;  %1524 = vmatpush1.bf16.msra.mxu1 %v4695_v25  ;;  %v4781_v24 = vld [vmem:[#allocation5 + $0x44c] ss:$16 sps:$4 sm:$0xff]   ;;  %v4776_v25 = vld [vmem:[#allocation5 + $0x440] ss:$16 sps:$4 sm:$0xff]  }
  0xae   :  { %1353 = vmatprep.subr.bf16.mxu0 %v4700_v26  ;;  %1525 = vmatprep.subr.bf16.mxu1 %v4703_v27  ;;  %v4779_v26 = vld [vmem:[#allocation5 + $0x448] ss:$16 sps:$4 sm:$0xff]   ;;  %v4784_v27 = vld [vmem:[#allocation5 + $0x464] ss:$16 sps:$4 sm:$0xff]  }
  0xb1   :  { %1354 = vmatpush1.bf16.msra.mxu0 %v4698_v28  ;;  %1526 = vmatpush1.bf16.msra.mxu1 %v4701_v29  ;;  %v4787_v28 = vld [vmem:[#allocation5 + $0x46c] ss:$16 sps:$4 sm:$0xff]   ;;  %v4782_v29 = vld [vmem:[#allocation5 + $0x460] ss:$16 sps:$4 sm:$0xff]  }
  0xb2   :  { %1355 = vmatprep.subr.bf16.mxu0 %v4706_v30  ;;  %1527 = vmatprep.subr.bf16.mxu1 %v4709_v31  ;;  %v4785_v30 = vld [vmem:[#allocation5 + $0x468] ss:$16 sps:$4 sm:$0xff]   ;;  %v4790_v31 = vld [vmem:[#allocation5 + $0x484] ss:$16 sps:$4 sm:$0xff]  }
  0xb5   :  { %1356 = vmatpush1.bf16.msra.mxu0 %v4704_v34  ;;  %1528 = vmatpush1.bf16.msra.mxu1 %v4707_v35  ;;  %v4791_v34 = vld [vmem:[#allocation5 + $0x488] ss:$16 sps:$4 sm:$0xff]   ;;  %v4796_v35 = vld [vmem:[#allocation5 + $0x4a4] ss:$16 sps:$4 sm:$0xff]  }
  0xb6   :  { %1357 = vmatprep.subr.bf16.mxu0 %v4712_v37  ;;  %1529 = vmatprep.subr.bf16.mxu1 %v4715_v38  ;;  %v4794_v37 = vld [vmem:[#allocation5 + $0x4a0] ss:$16 sps:$4 sm:$0xff]   ;;  %v4797_v38 = vld [vmem:[#allocation5 + $0x4a8] ss:$16 sps:$4 sm:$0xff]  }
  0xb9   :  { %1358 = vmatpush1.bf16.msra.mxu0 %v4710_v39  ;;  %1530 = vmatpush1.bf16.msra.mxu1 %v4713_v40  ;;  %v4802_v39 = vld [vmem:[#allocation5 + $0x4c4] ss:$16 sps:$4 sm:$0xff]   ;;  %v4805_v40 = vld [vmem:[#allocation5 + $0x4cc] ss:$16 sps:$4 sm:$0xff]  }
  0xba   :  { %1359 = vmatprep.subr.bf16.mxu0 %v4718_v41  ;;  %1531 = vmatprep.subr.bf16.mxu1 %v4721_v42  ;;  %v4800_v41 = vld [vmem:[#allocation5 + $0x4c0] ss:$16 sps:$4 sm:$0xff]   ;;  %v4803_v42 = vld [vmem:[#allocation5 + $0x4c8] ss:$16 sps:$4 sm:$0xff]  }
  0xbd   :  { %1360 = vmatpush1.bf16.msra.mxu0 %v4716_v43  ;;  %1532 = vmatpush1.bf16.msra.mxu1 %v4719_v44  ;;  %v4808_v43 = vld [vmem:[#allocation5 + $0x4e4] ss:$16 sps:$4 sm:$0xff]   ;;  %v4811_v44 = vld [vmem:[#allocation5 + $0x4ec] ss:$16 sps:$4 sm:$0xff]  }
  0xbe   :  { %1361 = vmatprep.subr.bf16.mxu0 %v4724_v45  ;;  %1533 = vmatprep.subr.bf16.mxu1 %v4727_v46  ;;  %v4806_v45 = vld [vmem:[#allocation5 + $0x4e0] ss:$16 sps:$4 sm:$0xff]   ;;  %v4809_v46 = vld [vmem:[#allocation5 + $0x4e8] ss:$16 sps:$4 sm:$0xff]  }
  0xc1   :  { %1362 = vmatpush1.bf16.msra.mxu0 %v4722_v47  ;;  %1534 = vmatpush1.bf16.msra.mxu1 %v4725_v48  ;;  %v4814_v47 = vld [vmem:[#allocation5 + $0x504] ss:$16 sps:$4 sm:$0xff]   ;;  %v4817_v48 = vld [vmem:[#allocation5 + $0x50c] ss:$16 sps:$4 sm:$0xff]  }
  0xc2   :  { %1363 = vmatprep.subr.bf16.mxu0 %v4730_v49  ;;  %1535 = vmatprep.subr.bf16.mxu1 %v4733_v50  ;;  %v4812_v49 = vld [vmem:[#allocation5 + $0x500] ss:$16 sps:$4 sm:$0xff]   ;;  %v4815_v50 = vld [vmem:[#allocation5 + $0x508] ss:$16 sps:$4 sm:$0xff]  }
  0xc5   :  { %1364 = vmatpush1.bf16.msra.mxu0 %v4728_v51  ;;  %1536 = vmatpush1.bf16.msra.mxu1 %v4731_v52  ;;  %v4820_v51 = vld [vmem:[#allocation5 + $0x524] ss:$16 sps:$4 sm:$0xff]   ;;  %v4823_v52 = vld [vmem:[#allocation5 + $0x52c] ss:$16 sps:$4 sm:$0xff]  }
  0xc6   :  { %1365 = vmatprep.subr.bf16.mxu0 %v4736_v53  ;;  %1537 = vmatprep.subr.bf16.mxu1 %v4739_v54  ;;  %v4818_v53 = vld [vmem:[#allocation5 + $0x520] ss:$16 sps:$4 sm:$0xff]   ;;  %v4821_v54 = vld [vmem:[#allocation5 + $0x528] ss:$16 sps:$4 sm:$0xff]  }
  0xc9   :  { %1366 = vmatpush1.bf16.msra.mxu0 %v4734_v55  ;;  %1538 = vmatpush1.bf16.msra.mxu1 %v4737_v56  ;;  %v4826_v55 = vld [vmem:[#allocation5 + $0x544] ss:$16 sps:$4 sm:$0xff]   ;;  %v4829_v56 = vld [vmem:[#allocation5 + $0x54c] ss:$16 sps:$4 sm:$0xff]  }
  0xca   :  { %1367 = vmatprep.subr.bf16.mxu0 %v4742_v57  ;;  %1539 = vmatprep.subr.bf16.mxu1 %v4745_v58  ;;  %v4824_v57 = vld [vmem:[#allocation5 + $0x540] ss:$16 sps:$4 sm:$0xff]   ;;  %v4827_v58 = vld [vmem:[#allocation5 + $0x548] ss:$16 sps:$4 sm:$0xff]  }
  0xcd   :  { %1368 = vmatpush1.bf16.msra.mxu0 %v4740_v59  ;;  %1540 = vmatpush1.bf16.msra.mxu1 %v4743_v60  ;;  %v4832_v59 = vld [vmem:[#allocation5 + $0x564] ss:$16 sps:$4 sm:$0xff]   ;;  %v4835_v60 = vld [vmem:[#allocation5 + $0x56c] ss:$16 sps:$4 sm:$0xff]  }
  0xce   :  { %1369 = vmatprep.subr.bf16.mxu0 %v4748_v61  ;;  %1541 = vmatprep.subr.bf16.mxu1 %v4751_v62  ;;  %v4830_v61 = vld [vmem:[#allocation5 + $0x560] ss:$16 sps:$4 sm:$0xff]   ;;  %v4833_v62 = vld [vmem:[#allocation5 + $0x568] ss:$16 sps:$4 sm:$0xff]  }
  0xd1   :  { %1370 = vmatpush1.bf16.msra.mxu0 %v4746_v63  ;;  %1542 = vmatpush1.bf16.msra.mxu1 %v4749_v0  ;;  %v4838_v63 = vld [vmem:[#allocation5 + $0x584] ss:$16 sps:$4 sm:$0xff]   ;;  %v4841_v0 = vld [vmem:[#allocation5 + $0x58c] ss:$16 sps:$4 sm:$0xff]  }
  0xd2   :  { %1371 = vmatprep.subr.bf16.mxu0 %v4754_v1  ;;  %1543 = vmatprep.subr.bf16.mxu1 %v4757_v2  ;;  %v4836_v1 = vld [vmem:[#allocation5 + $0x580] ss:$16 sps:$4 sm:$0xff]   ;;  %v4839_v2 = vld [vmem:[#allocation5 + $0x588] ss:$16 sps:$4 sm:$0xff]  }
  0xd5   :  { %1372 = vmatpush1.bf16.msra.mxu0 %v4752_v3  ;;  %1544 = vmatpush1.bf16.msra.mxu1 %v4755_v4  ;;  %v4844_v3 = vld [vmem:[#allocation5 + $0x5a4] ss:$16 sps:$4 sm:$0xff]   ;;  %v4847_v4 = vld [vmem:[#allocation5 + $0x5ac] ss:$16 sps:$4 sm:$0xff]  }
  0xd6   :  { %1373 = vmatprep.subr.bf16.mxu0 %v4760_v5  ;;  %1545 = vmatprep.subr.bf16.mxu1 %v4763_v6  ;;  %v4842_v5 = vld [vmem:[#allocation5 + $0x5a0] ss:$16 sps:$4 sm:$0xff]   ;;  %v4845_v6 = vld [vmem:[#allocation5 + $0x5a8] ss:$16 sps:$4 sm:$0xff]  }
  0xd9   :  { %1374 = vmatpush1.bf16.msra.mxu0 %v4758_v7  ;;  %1546 = vmatpush1.bf16.msra.mxu1 %v4761_v8  ;;  %v4850_v7 = vld [vmem:[#allocation5 + $0x5c4] ss:$16 sps:$4 sm:$0xff]   ;;  %v4853_v8 = vld [vmem:[#allocation5 + $0x5cc] ss:$16 sps:$4 sm:$0xff]  }
  0xda   :  { %1386 = vmatprep.subr.bf16.mxu0 %v4766_v9  ;;  %1558 = vmatprep.subr.bf16.mxu1 %v4769_v12  ;;  %v4848_v9 = vld [vmem:[#allocation5 + $0x5c0] ss:$16 sps:$4 sm:$0xff]   ;;  %v4859_v12 = vld [vmem:[#allocation5 + $0x5ec] ss:$16 sps:$4 sm:$0xff]  }
  0xdc   :  { %1376 = vmatmul.mubr.bf16.vlgmr.msra.gmra.mrb[0].mxu0 %v115_v15  ;;  %1548 = vmatmul.mubr.bf16.vlgmr.msra.gmra.mrb[0].mxu1 %v115_v15  ;;  %v103_v15 = vld [vmem:[#allocation2 + $0x20] sm:$0xff] }
  0xdd   :  { %1387 = vmatpush1.bf16.msra.mxu0 %v4764_v13  ;;  %1559 = vmatpush1.bf16.msra.mxu1 %v4767_v14  ;;  %v4854_v13 = vld [vmem:[#allocation5 + $0x5e0] ss:$16 sps:$4 sm:$0xff]   ;;  %v4857_v14 = vld [vmem:[#allocation5 + $0x5e8] ss:$16 sps:$4 sm:$0xff]  }
  0xde   :  { %1388 = vmatprep.subr.bf16.mxu0 %v4772_v16  ;;  %1560 = vmatprep.subr.bf16.mxu1 %v4775_v17  ;;  %v110_v16 = vld [vmem:[#allocation2 + $0x58] sm:$0xff]  ;;  %v4862_v17 = vld [vmem:[#allocation5 + $0x604] ss:$16 sps:$4 sm:$0xff]  }
  0xdf   :  { %1418 = vmatprep.mubr.bf16.mxu0 %v118_v23  ;;  %1590 = vmatprep.mubr.bf16.mxu1 %v118_v23  ;;  %v117_v21 = vpack.c.bf16 %v110_v16, %v103_v15  ;;  %v4871_v23 = vld [vmem:[#allocation7 + $0xc] ss:$16 sps:$4 sm:$0xff]   ;;  %v4944_v16 = vld [vmem:[#allocation7 + $0x1a0] ss:$16 sps:$4 sm:$0xff]  }
  0xe0   :  { %v4949_v15 = vld [vmem:[#allocation7 + $0x1ac] ss:$16 sps:$4 sm:$0xff]  }
  0xe1   :  { %1389 = vmatpush1.bf16.msra.mxu0 %v4770_v19  ;;  %1561 = vmatpush1.bf16.msra.mxu1 %v4773_v20  ;;  %v4860_v19 = vld [vmem:[#allocation5 + $0x600] ss:$16 sps:$4 sm:$0xff]   ;;  %v4863_v20 = vld [vmem:[#allocation5 + $0x608] ss:$16 sps:$4 sm:$0xff]  }
  0xe2   :  { %1390 = vmatprep.subr.bf16.mxu0 %v4778_v22  ;;  %1562 = vmatprep.subr.bf16.mxu1 %v4781_v24  ;;  %v4868_v22 = vld [vmem:[#allocation7 + $0x4] ss:$16 sps:$4 sm:$0xff]   ;;  %v5433_v24 = vmov 0  }
  0xe5   :  { %1391 = vmatpush1.bf16.msra.mxu0 %v4776_v25  ;;  %1563 = vmatpush1.bf16.msra.mxu1 %v4779_v26  ;;  %v105_v25 = vld [vmem:[#allocation2 + $0x30] sm:$0xff]  ;;  %v112_v26 = vld [vmem:[#allocation2 + $0x68] sm:$0xff] }
  0xe6   :  { %1392 = vmatprep.subr.bf16.mxu0 %v4784_v27  ;;  %1564 = vmatprep.subr.bf16.mxu1 %v4787_v28  ;;  %v4866_v27 = vld [vmem:[#allocation7] ss:$16 sps:$4 sm:$0xff]   ;;  %v4869_v28 = vld [vmem:[#allocation7 + $0x8] ss:$16 sps:$4 sm:$0xff]  }
  0xe9   :  { %1393 = vmatpush1.bf16.msra.mxu0 %v4782_v29  ;;  %1565 = vmatpush1.bf16.msra.mxu1 %v4785_v30  ;;  %v119_v29 = vpack.c.bf16 %v112_v26, %v105_v25  ;;  %v4874_v30 = vld [vmem:[#allocation7 + $0x24] ss:$16 sps:$4 sm:$0xff]   ;;  %v4959_v25 = vld [vmem:[#allocation7 + $0x1e8] ss:$16 sps:$4 sm:$0xff]  }
  0xea   :  { %1394 = vmatprep.subr.bf16.mxu0 %v4790_v31  ;;  %1566 = vmatprep.subr.bf16.mxu1 %v4793_v32  ;;  %v4877_v31 = vld [vmem:[#allocation7 + $0x2c] ss:$16 sps:$4 sm:$0xff]   ;;  %v4872_v32 = vld [vmem:[#allocation7 + $0x20] ss:$16 sps:$4 sm:$0xff]   ;;  %v4964_v26 = vld [vmem:[#allocation7 + $0x204] ss:$16 sps:$4 sm:$0xff]  }
  0xed   :  { %1395 = vmatpush1.bf16.msra.mxu0 %v4788_v33  ;;  %1567 = vmatpush1.bf16.msra.mxu1 %v4791_v34  ;;  %v4875_v33 = vld [vmem:[#allocation7 + $0x28] ss:$16 sps:$4 sm:$0xff]   ;;  %v4880_v34 = vld [vmem:[#allocation7 + $0x44] ss:$16 sps:$4 sm:$0xff]  }
  0xee   :  { %1396 = vmatprep.subr.bf16.mxu0 %v4796_v35  ;;  %1568 = vmatprep.subr.bf16.mxu1 %v4799_v36  ;;  %v4883_v35 = vld [vmem:[#allocation7 + $0x4c] ss:$16 sps:$4 sm:$0xff]   ;;  %v4878_v36 = vld [vmem:[#allocation7 + $0x40] ss:$16 sps:$4 sm:$0xff]  }
  0xf1   :  { %1397 = vmatpush1.bf16.msra.mxu0 %v4794_v37  ;;  %1569 = vmatpush1.bf16.msra.mxu1 %v4797_v38  ;;  %v4881_v37 = vld [vmem:[#allocation7 + $0x48] ss:$16 sps:$4 sm:$0xff]   ;;  %v4886_v38 = vld [vmem:[#allocation7 + $0x64] ss:$16 sps:$4 sm:$0xff]  }
  0xf2   :  { %1398 = vmatprep.subr.bf16.mxu0 %v4802_v39  ;;  %1570 = vmatprep.subr.bf16.mxu1 %v4805_v40  ;;  %v4889_v39 = vld [vmem:[#allocation7 + $0x6c] ss:$16 sps:$4 sm:$0xff]   ;;  %v4884_v40 = vld [vmem:[#allocation7 + $0x60] ss:$16 sps:$4 sm:$0xff]  }
  0xf5   :  { %1399 = vmatpush1.bf16.msra.mxu0 %v4800_v41  ;;  %1571 = vmatpush1.bf16.msra.mxu1 %v4803_v42  ;;  %v4887_v41 = vld [vmem:[#allocation7 + $0x68] ss:$16 sps:$4 sm:$0xff]   ;;  %v4892_v42 = vld [vmem:[#allocation7 + $0x84] ss:$16 sps:$4 sm:$0xff]  }
  0xf6   :  { %1400 = vmatprep.subr.bf16.mxu0 %v4808_v43  ;;  %1572 = vmatprep.subr.bf16.mxu1 %v4811_v44  ;;  %v4895_v43 = vld [vmem:[#allocation7 + $0x8c] ss:$16 sps:$4 sm:$0xff]   ;;  %v4890_v44 = vld [vmem:[#allocation7 + $0x80] ss:$16 sps:$4 sm:$0xff]  }
  0xf9   :  { %1401 = vmatpush1.bf16.msra.mxu0 %v4806_v45  ;;  %1573 = vmatpush1.bf16.msra.mxu1 %v4809_v46  ;;  %v4893_v45 = vld [vmem:[#allocation7 + $0x88] ss:$16 sps:$4 sm:$0xff]   ;;  %v4898_v46 = vld [vmem:[#allocation7 + $0xa4] ss:$16 sps:$4 sm:$0xff]  }
  0xfa   :  { %1402 = vmatprep.subr.bf16.mxu0 %v4814_v47  ;;  %1574 = vmatprep.subr.bf16.mxu1 %v4817_v48  ;;  %v4901_v47 = vld [vmem:[#allocation7 + $0xac] ss:$16 sps:$4 sm:$0xff]   ;;  %v4896_v48 = vld [vmem:[#allocation7 + $0xa0] ss:$16 sps:$4 sm:$0xff]  }
  0xfd   :  { %1403 = vmatpush1.bf16.msra.mxu0 %v4812_v49  ;;  %1575 = vmatpush1.bf16.msra.mxu1 %v4815_v50  ;;  %v4899_v49 = vld [vmem:[#allocation7 + $0xa8] ss:$16 sps:$4 sm:$0xff]   ;;  %v4904_v50 = vld [vmem:[#allocation7 + $0xc4] ss:$16 sps:$4 sm:$0xff]  }
  0xfe   :  { %1404 = vmatprep.subr.bf16.mxu0 %v4820_v51  ;;  %1576 = vmatprep.subr.bf16.mxu1 %v4823_v52  ;;  %v4907_v51 = vld [vmem:[#allocation7 + $0xcc] ss:$16 sps:$4 sm:$0xff]   ;;  %v4902_v52 = vld [vmem:[#allocation7 + $0xc0] ss:$16 sps:$4 sm:$0xff]  }
 0x101   :  { %1405 = vmatpush1.bf16.msra.mxu0 %v4818_v53  ;;  %1577 = vmatpush1.bf16.msra.mxu1 %v4821_v54  ;;  %v4905_v53 = vld [vmem:[#allocation7 + $0xc8] ss:$16 sps:$4 sm:$0xff]   ;;  %v4910_v54 = vld [vmem:[#allocation7 + $0xe4] ss:$16 sps:$4 sm:$0xff]  }
 0x102   :  { %1406 = vmatprep.subr.bf16.mxu0 %v4826_v55  ;;  %1578 = vmatprep.subr.bf16.mxu1 %v4829_v56  ;;  %v4913_v55 = vld [vmem:[#allocation7 + $0xec] ss:$16 sps:$4 sm:$0xff]   ;;  %v4908_v56 = vld [vmem:[#allocation7 + $0xe0] ss:$16 sps:$4 sm:$0xff]  }
 0x105   :  { %1407 = vmatpush1.bf16.msra.mxu0 %v4824_v57  ;;  %1579 = vmatpush1.bf16.msra.mxu1 %v4827_v58  ;;  %v4911_v57 = vld [vmem:[#allocation7 + $0xe8] ss:$16 sps:$4 sm:$0xff]   ;;  %v4916_v58 = vld [vmem:[#allocation7 + $0x104] ss:$16 sps:$4 sm:$0xff]  }
 0x106   :  { %1408 = vmatprep.subr.bf16.mxu0 %v4832_v59  ;;  %1580 = vmatprep.subr.bf16.mxu1 %v4835_v60  ;;  %v4919_v59 = vld [vmem:[#allocation7 + $0x10c] ss:$16 sps:$4 sm:$0xff]   ;;  %v4914_v60 = vld [vmem:[#allocation7 + $0x100] ss:$16 sps:$4 sm:$0xff]  }
 0x109   :  { %1409 = vmatpush1.bf16.msra.mxu0 %v4830_v61  ;;  %1581 = vmatpush1.bf16.msra.mxu1 %v4833_v62  ;;  %v4917_v61 = vld [vmem:[#allocation7 + $0x108] ss:$16 sps:$4 sm:$0xff]   ;;  %v4922_v62 = vld [vmem:[#allocation7 + $0x124] ss:$16 sps:$4 sm:$0xff]  }
 0x10a   :  { %1410 = vmatprep.subr.bf16.mxu0 %v4838_v63  ;;  %1582 = vmatprep.subr.bf16.mxu1 %v4841_v0  ;;  %v4925_v63 = vld [vmem:[#allocation7 + $0x12c] ss:$16 sps:$4 sm:$0xff]   ;;  %v4920_v0 = vld [vmem:[#allocation7 + $0x120] ss:$16 sps:$4 sm:$0xff]  }
 0x10d   :  { %1411 = vmatpush1.bf16.msra.mxu0 %v4836_v1  ;;  %1583 = vmatpush1.bf16.msra.mxu1 %v4839_v2  ;;  %v4923_v1 = vld [vmem:[#allocation7 + $0x128] ss:$16 sps:$4 sm:$0xff]   ;;  %v4928_v2 = vld [vmem:[#allocation7 + $0x144] ss:$16 sps:$4 sm:$0xff]  }
 0x10e   :  { %1412 = vmatprep.subr.bf16.mxu0 %v4844_v3  ;;  %1584 = vmatprep.subr.bf16.mxu1 %v4847_v4  ;;  %v4931_v3 = vld [vmem:[#allocation7 + $0x14c] ss:$16 sps:$4 sm:$0xff]   ;;  %v4926_v4 = vld [vmem:[#allocation7 + $0x140] ss:$16 sps:$4 sm:$0xff]  }
 0x111   :  { %1413 = vmatpush1.bf16.msra.mxu0 %v4842_v5  ;;  %1585 = vmatpush1.bf16.msra.mxu1 %v4845_v6  ;;  %v4929_v5 = vld [vmem:[#allocation7 + $0x148] ss:$16 sps:$4 sm:$0xff]   ;;  %v4934_v6 = vld [vmem:[#allocation7 + $0x164] ss:$16 sps:$4 sm:$0xff]  }
 0x112   :  { %1414 = vmatprep.subr.bf16.mxu0 %v4850_v7  ;;  %1586 = vmatprep.subr.bf16.mxu1 %v4853_v8  ;;  %v4937_v7 = vld [vmem:[#allocation7 + $0x16c] ss:$16 sps:$4 sm:$0xff]   ;;  %v4932_v8 = vld [vmem:[#allocation7 + $0x160] ss:$16 sps:$4 sm:$0xff]  }
 0x115   :  { %1415 = vmatpush1.bf16.msra.mxu0 %v4848_v9  ;;  %1587 = vmatpush1.bf16.msra.mxu1 %v4851_v10  ;;  %v4935_v9 = vld [vmem:[#allocation7 + $0x168] ss:$16 sps:$4 sm:$0xff]   ;;  %v4940_v10 = vld [vmem:[#allocation7 + $0x184] ss:$16 sps:$4 sm:$0xff]  }
 0x116   :  { %1416 = vmatprep.subr.bf16.mxu0 %v4856_v11  ;;  %1588 = vmatprep.subr.bf16.mxu1 %v4859_v12  ;;  %v4943_v11 = vld [vmem:[#allocation7 + $0x18c] ss:$16 sps:$4 sm:$0xff]   ;;  %v4938_v12 = vld [vmem:[#allocation7 + $0x180] ss:$16 sps:$4 sm:$0xff]  }
 0x119   :  { %1417 = vmatpush1.bf16.msra.mxu0 %v4854_v13  ;;  %1589 = vmatpush1.bf16.msra.mxu1 %v4857_v14  ;;  %v4941_v13 = vld [vmem:[#allocation7 + $0x188] ss:$16 sps:$4 sm:$0xff]   ;;  %v4946_v14 = vld [vmem:[#allocation7 + $0x1a4] ss:$16 sps:$4 sm:$0xff]  }
 0x11a   :  { %1429 = vmatprep.subr.bf16.mxu0 %v4862_v17  ;;  %1601 = vmatprep.subr.bf16.mxu1 %v4865_v18  ;;  %v4947_v17 = vld [vmem:[#allocation7 + $0x1a8] ss:$16 sps:$4 sm:$0xff]   ;;  %v4952_v18 = vld [vmem:[#allocation7 + $0x1c4] ss:$16 sps:$4 sm:$0xff]  }
 0x11c   :  { %1419 = vmatmul.mubr.bf16.vlgmr.msra.gmra.mrb[0].mxu0 %v117_v21  ;;  %1591 = vmatmul.mubr.bf16.vlgmr.msra.gmra.mrb[0].mxu1 %v117_v21  ;;  %v4953_v21 = vld [vmem:[#allocation7 + $0x1c8] ss:$16 sps:$4 sm:$0xff]  }
 0x11d   :  { %1430 = vmatpush1.bf16.msra.mxu0 %v4860_v19  ;;  %1602 = vmatpush1.bf16.msra.mxu1 %v4863_v20  ;;  %v4955_v19 = vld [vmem:[#allocation7 + $0x1cc] ss:$16 sps:$4 sm:$0xff]   ;;  %v4950_v20 = vld [vmem:[#allocation7 + $0x1c0] ss:$16 sps:$4 sm:$0xff]  }
 0x11e   :  { %1461 = vmatprep.mubr.bf16.mxu0 %v5433_v24  ;;  %1633 = vmatprep.mubr.bf16.mxu1 %v5433_v24  ;;  %v4956_v24 = vld [vmem:[#allocation7 + $0x1e0] ss:$16 sps:$4 sm:$0xff]  }
 0x11f   :  { %2446 = vmatprep.subr.bf16.mxu0 %v4868_v22  ;;  %2532 = vmatprep.subr.bf16.mxu1 %v4871_v23  ;;  %v4958_v22 = vld [vmem:[#allocation7 + $0x1e4] ss:$16 sps:$4 sm:$0xff]   ;;  %v4961_v23 = vld [vmem:[#allocation7 + $0x1ec] ss:$16 sps:$4 sm:$0xff]  }
 0x128   :  { %4166 = vmatmul.mubr.msk.bf16.vlgmr.msra.gmra.mrb[0].mxu0 %vm1296_vm0, %v119_v29  ;;  %4167 = vmatmul.mubr.msk.bf16.vlgmr.msra.gmra.mrb[0].mxu1 %vm1296_vm0, %v119_v29 }
 0x129   :  { %2447 = vmatpush1.bf16.msra.mxu0 %v4866_v27  ;;  %2533 = vmatpush1.bf16.msra.mxu1 %v4869_v28  ;;  %v4967_v27 = vld [vmem:[#allocation7 + $0x20c] ss:$16 sps:$4 sm:$0xff]  }
 0x12a   :  { %2448 = vmatprep.subr.bf16.mxu0 %v4874_v30  ;;  %2534 = vmatprep.subr.bf16.mxu1 %v4877_v31 }
 0x12d   :  { %2449 = vmatpush1.bf16.msra.mxu0 %v4872_v32  ;;  %2535 = vmatpush1.bf16.msra.mxu1 %v4875_v33 }
 0x12e   :  { %2450 = vmatprep.subr.bf16.mxu0 %v4880_v34  ;;  %2536 = vmatprep.subr.bf16.mxu1 %v4883_v35 }
 0x131   :  { %2451 = vmatpush1.bf16.msra.mxu0 %v4878_v36  ;;  %2537 = vmatpush1.bf16.msra.mxu1 %v4881_v37 }
 0x132   :  { %2452 = vmatprep.subr.bf16.mxu0 %v4886_v38  ;;  %2538 = vmatprep.subr.bf16.mxu1 %v4889_v39 }
 0x135   :  { %2453 = vmatpush1.bf16.msra.mxu0 %v4884_v40  ;;  %2539 = vmatpush1.bf16.msra.mxu1 %v4887_v41 }
 0x136   :  { %2454 = vmatprep.subr.bf16.mxu0 %v4892_v42  ;;  %2540 = vmatprep.subr.bf16.mxu1 %v4895_v43 }
 0x139   :  { %2455 = vmatpush1.bf16.msra.mxu0 %v4890_v44  ;;  %2541 = vmatpush1.bf16.msra.mxu1 %v4893_v45 }
 0x13a   :  { %2456 = vmatprep.subr.bf16.mxu0 %v4898_v46  ;;  %2542 = vmatprep.subr.bf16.mxu1 %v4901_v47 }
 0x13d   :  { %2457 = vmatpush1.bf16.msra.mxu0 %v4896_v48  ;;  %2543 = vmatpush1.bf16.msra.mxu1 %v4899_v49  ;;  %v4962_v48 = vld [vmem:[#allocation7 + $0x200] ss:$16 sps:$4 sm:$0xff]   ;;  %v4965_v49 = vld [vmem:[#allocation7 + $0x208] ss:$16 sps:$4 sm:$0xff]  }
 0x13e   :  { %2458 = vmatprep.subr.bf16.mxu0 %v4904_v50  ;;  %2544 = vmatprep.subr.bf16.mxu1 %v4907_v51  ;;  %v4970_v50 = vld [vmem:[#allocation7 + $0x224] ss:$16 sps:$4 sm:$0xff]   ;;  %v4973_v51 = vld [vmem:[#allocation7 + $0x22c] ss:$16 sps:$4 sm:$0xff]  }
 0x141   :  { %2459 = vmatpush1.bf16.msra.mxu0 %v4902_v52  ;;  %2545 = vmatpush1.bf16.msra.mxu1 %v4905_v53  ;;  %v4968_v52 = vld [vmem:[#allocation7 + $0x220] ss:$16 sps:$4 sm:$0xff]   ;;  %v4971_v53 = vld [vmem:[#allocation7 + $0x228] ss:$16 sps:$4 sm:$0xff]  }
 0x142   :  { %2460 = vmatprep.subr.bf16.mxu0 %v4910_v54  ;;  %2546 = vmatprep.subr.bf16.mxu1 %v4913_v55  ;;  %v4976_v54 = vld [vmem:[#allocation7 + $0x244] ss:$16 sps:$4 sm:$0xff]   ;;  %v4979_v55 = vld [vmem:[#allocation7 + $0x24c] ss:$16 sps:$4 sm:$0xff]  }
 0x145   :  { %2461 = vmatpush1.bf16.msra.mxu0 %v4908_v56  ;;  %2547 = vmatpush1.bf16.msra.mxu1 %v4911_v57  ;;  %v4974_v56 = vld [vmem:[#allocation7 + $0x240] ss:$16 sps:$4 sm:$0xff]   ;;  %v4977_v57 = vld [vmem:[#allocation7 + $0x248] ss:$16 sps:$4 sm:$0xff]  }
 0x146   :  { %2462 = vmatprep.subr.bf16.mxu0 %v4916_v58  ;;  %2548 = vmatprep.subr.bf16.mxu1 %v4919_v59  ;;  %v4982_v58 = vld [vmem:[#allocation7 + $0x264] ss:$16 sps:$4 sm:$0xff]   ;;  %v4985_v59 = vld [vmem:[#allocation7 + $0x26c] ss:$16 sps:$4 sm:$0xff]  }
 0x149   :  { %2463 = vmatpush1.bf16.msra.mxu0 %v4914_v60  ;;  %2549 = vmatpush1.bf16.msra.mxu1 %v4917_v61  ;;  %v4980_v60 = vld [vmem:[#allocation7 + $0x260] ss:$16 sps:$4 sm:$0xff]   ;;  %v4983_v61 = vld [vmem:[#allocation7 + $0x268] ss:$16 sps:$4 sm:$0xff]  }
 0x14a   :  { %2464 = vmatprep.subr.bf16.mxu0 %v4922_v62  ;;  %2550 = vmatprep.subr.bf16.mxu1 %v4925_v63  ;;  %v4988_v62 = vld [vmem:[#allocation7 + $0x284] ss:$16 sps:$4 sm:$0xff]   ;;  %v4991_v63 = vld [vmem:[#allocation7 + $0x28c] ss:$16 sps:$4 sm:$0xff]  }
 0x14d   :  { %2465 = vmatpush1.bf16.msra.mxu0 %v4920_v0  ;;  %2551 = vmatpush1.bf16.msra.mxu1 %v4923_v1  ;;  %v4986_v0 = vld [vmem:[#allocation7 + $0x280] ss:$16 sps:$4 sm:$0xff]   ;;  %v4989_v1 = vld [vmem:[#allocation7 + $0x288] ss:$16 sps:$4 sm:$0xff]  }
 0x14e   :  { %2466 = vmatprep.subr.bf16.mxu0 %v4928_v2  ;;  %2552 = vmatprep.subr.bf16.mxu1 %v4931_v3  ;;  %v4994_v2 = vld [vmem:[#allocation7 + $0x2a4] ss:$16 sps:$4 sm:$0xff]   ;;  %v4997_v3 = vld [vmem:[#allocation7 + $0x2ac] ss:$16 sps:$4 sm:$0xff]  }
 0x151   :  { %2467 = vmatpush1.bf16.msra.mxu0 %v4926_v4  ;;  %2553 = vmatpush1.bf16.msra.mxu1 %v4929_v5  ;;  %v4992_v4 = vld [vmem:[#allocation7 + $0x2a0] ss:$16 sps:$4 sm:$0xff]   ;;  %v4995_v5 = vld [vmem:[#allocation7 + $0x2a8] ss:$16 sps:$4 sm:$0xff]  }
 0x152   :  { %2468 = vmatprep.subr.bf16.mxu0 %v4934_v6  ;;  %2554 = vmatprep.subr.bf16.mxu1 %v4937_v7  ;;  %v5000_v6 = vld [vmem:[#allocation7 + $0x2c4] ss:$16 sps:$4 sm:$0xff]   ;;  %v5003_v7 = vld [vmem:[#allocation7 + $0x2cc] ss:$16 sps:$4 sm:$0xff]  }
 0x155   :  { %2469 = vmatpush1.bf16.msra.mxu0 %v4932_v8  ;;  %2555 = vmatpush1.bf16.msra.mxu1 %v4935_v9  ;;  %v4998_v8 = vld [vmem:[#allocation7 + $0x2c0] ss:$16 sps:$4 sm:$0xff]   ;;  %v5001_v9 = vld [vmem:[#allocation7 + $0x2c8] ss:$16 sps:$4 sm:$0xff]  }
 0x156   :  { %2470 = vmatprep.subr.bf16.mxu0 %v4940_v10  ;;  %2556 = vmatprep.subr.bf16.mxu1 %v4943_v11  ;;  %v5006_v10 = vld [vmem:[#allocation7 + $0x2e4] ss:$16 sps:$4 sm:$0xff]   ;;  %v5009_v11 = vld [vmem:[#allocation7 + $0x2ec] ss:$16 sps:$4 sm:$0xff]  }
 0x159   :  { %2471 = vmatpush1.bf16.msra.mxu0 %v4938_v12  ;;  %2557 = vmatpush1.bf16.msra.mxu1 %v4941_v13  ;;  %v5004_v12 = vld [vmem:[#allocation7 + $0x2e0] ss:$16 sps:$4 sm:$0xff]   ;;  %v5007_v13 = vld [vmem:[#allocation7 + $0x2e8] ss:$16 sps:$4 sm:$0xff]  }
 0x15a   :  { %2472 = vmatprep.subr.bf16.mxu0 %v4946_v14  ;;  %2558 = vmatprep.subr.bf16.mxu1 %v4949_v15  ;;  %v5012_v14 = vld [vmem:[#allocation7 + $0x304] ss:$16 sps:$4 sm:$0xff]   ;;  %v5015_v15 = vld [vmem:[#allocation7 + $0x30c] ss:$16 sps:$4 sm:$0xff]  }
 0x15d   :  { %2473 = vmatpush1.bf16.msra.mxu0 %v4944_v16  ;;  %2559 = vmatpush1.bf16.msra.mxu1 %v4947_v17  ;;  %v5010_v16 = vld [vmem:[#allocation7 + $0x300] ss:$16 sps:$4 sm:$0xff]   ;;  %v5013_v17 = vld [vmem:[#allocation7 + $0x308] ss:$16 sps:$4 sm:$0xff]  }
 0x15e   :  { %2474 = vmatprep.subr.bf16.mxu0 %v4952_v18  ;;  %2560 = vmatprep.subr.bf16.mxu1 %v4955_v19  ;;  %v5018_v18 = vld [vmem:[#allocation7 + $0x324] ss:$16 sps:$4 sm:$0xff]   ;;  %v5021_v19 = vld [vmem:[#allocation7 + $0x32c] ss:$16 sps:$4 sm:$0xff]  }
 0x161   :  { %2475 = vmatpush1.bf16.msra.mxu0 %v4950_v20  ;;  %2561 = vmatpush1.bf16.msra.mxu1 %v4953_v21  ;;  %v5016_v20 = vld [vmem:[#allocation7 + $0x320] ss:$16 sps:$4 sm:$0xff]   ;;  %v5019_v21 = vld [vmem:[#allocation7 + $0x328] ss:$16 sps:$4 sm:$0xff]  }
 0x162   :  { %2476 = vmatprep.subr.bf16.mxu0 %v4958_v22  ;;  %2562 = vmatprep.subr.bf16.mxu1 %v4961_v23  ;;  %v5024_v22 = vld [vmem:[#allocation7 + $0x344] ss:$16 sps:$4 sm:$0xff]   ;;  %v5027_v23 = vld [vmem:[#allocation7 + $0x34c] ss:$16 sps:$4 sm:$0xff]  }
 0x165   :  { %2477 = vmatpush1.bf16.msra.mxu0 %v4956_v24  ;;  %2563 = vmatpush1.bf16.msra.mxu1 %v4959_v25  ;;  %v5022_v24 = vld [vmem:[#allocation7 + $0x340] ss:$16 sps:$4 sm:$0xff]   ;;  %v5025_v25 = vld [vmem:[#allocation7 + $0x348] ss:$16 sps:$4 sm:$0xff]  }
 0x166   :  { %2489 = vmatprep.subr.bf16.mxu0 %v4964_v26  ;;  %2575 = vmatprep.subr.bf16.mxu1 %v4967_v27  ;;  %v5030_v26 = vld [vmem:[#allocation7 + $0x364] ss:$16 sps:$4 sm:$0xff]   ;;  %v5033_v27 = vld [vmem:[#allocation7 + $0x36c] ss:$16 sps:$4 sm:$0xff]  }
 0x1fb   :  { %v1463_v28 = vpop.f32.mrb[0].mxu0  ;;  %v1635_v29 = vpop.f32.mrb[0].mxu1 }
 0x1fc   :  { %v1465_v30 = vpop.f32.mrb[1].mxu0  ;;  %v1637_v31 = vpop.f32.mrb[1].mxu1  ;;  %v1644_v34 = vmax.f32 %v1463_v28, 0.0  ;;  %v1646_v35 = vmax.f32 %v1635_v29, 0.0  ;;  %v5028_v28 = vld [vmem:[#allocation7 + $0x360] ss:$16 sps:$4 sm:$0xff]  }
 0x1fd   :  { %v1467_v32 = vpop.f32.mrb[2].mxu0  ;;  %v1639_v33 = vpop.f32.mrb[2].mxu1  ;;  %v1645_v40 = vmax.f32 %v1465_v30, 0.0  ;;  %v1647_v41 = vmax.f32 %v1637_v31, 0.0  ;;  %v5031_v29 = vld [vmem:[#allocation7 + $0x368] ss:$16 sps:$4 sm:$0xff]  }
 0x1fe   :  { %v1648_v36 = vmax.f32 %v1467_v32, 0.0  ;;  %v1650_v37 = vmax.f32 %v1639_v33, 0.0  ;;  %v1469_v38 = vpop.f32.mrb[3].mxu0  ;;  %v1641_v39 = vpop.f32.mrb[3].mxu1  ;;  %v5036_v30 = vld [vmem:[#allocation7 + $0x384] ss:$16 sps:$4 sm:$0xff]  }
 0x1ff   :  { %v1649_v42 = vmax.f32 %v1469_v38, 0.0  ;;  %v1651_v43 = vmax.f32 %v1641_v39, 0.0  ;;  %v5039_v31 = vld [vmem:[#allocation7 + $0x38c] ss:$16 sps:$4 sm:$0xff]   ;;  %v5034_v32 = vld [vmem:[#allocation7 + $0x380] ss:$16 sps:$4 sm:$0xff]  }
 0x200   :  { %v1652_v44 = vpack.c.bf16 %v1648_v36, %v1644_v34  ;;  %v5551_v45 = vpack.c.bf16 %v1650_v37, %v1646_v35  ;;  %v5037_v33 = vld [vmem:[#allocation7 + $0x388] ss:$16 sps:$4 sm:$0xff]   ;;  %v5042_v34 = vld [vmem:[#allocation7 + $0x3a4] ss:$16 sps:$4 sm:$0xff]   ;;  %v5045_v35 = vld [vmem:[#allocation7 + $0x3ac] ss:$16 sps:$4 sm:$0xff]  }
 0x201   :  { %v1653_v46 = vpack.c.bf16 %v1649_v42, %v1645_v40  ;;  %v1655_v47 = vpack.c.bf16 %v1651_v43, %v1647_v41  ;;  %v5040_v36 = vld [vmem:[#allocation7 + $0x3a0] ss:$16 sps:$4 sm:$0xff]   ;;  %v5043_v37 = vld [vmem:[#allocation7 + $0x3a8] ss:$16 sps:$4 sm:$0xff]   ;;  %v5048_v38 = vld [vmem:[#allocation7 + $0x3c4] ss:$16 sps:$4 sm:$0xff]  }
 0x202   :  { %v5051_v39 = vld [vmem:[#allocation7 + $0x3cc] ss:$16 sps:$4 sm:$0xff]   ;;  %v5046_v40 = vld [vmem:[#allocation7 + $0x3c0] ss:$16 sps:$4 sm:$0xff]   ;;  %v5049_v41 = vld [vmem:[#allocation7 + $0x3c8] ss:$16 sps:$4 sm:$0xff]  }
 0x203   :  { %2478 = vmatprep.mubr.bf16.mxu0 %v1653_v46  ;;  %2564 = vmatprep.mubr.bf16.mxu1 %v1653_v46  ;;  %v5054_v42 = vld [vmem:[#allocation7 + $0x3e4] ss:$16 sps:$4 sm:$0xff]   ;;  %v5057_v43 = vld [vmem:[#allocation7 + $0x3ec] ss:$16 sps:$4 sm:$0xff]   ;;  %v5055_v46 = vld [vmem:[#allocation7 + $0x3e8] ss:$16 sps:$4 sm:$0xff]  }
 0x204   :  { %2479 = vmatmul.mubr.bf16.vlgmr.msra.gmra.mrb[4].mxu0 %v1652_v44  ;;  %2565 = vmatmul.mubr.bf16.vlgmr.msra.gmra.mrb[4].mxu1 %v1652_v44  ;;  %v5052_v44 = vld [vmem:[#allocation7 + $0x3e0] ss:$16 sps:$4 sm:$0xff]  }
 0x205   :  { %2490 = vmatpush1.bf16.msra.mxu0 %v4962_v48  ;;  %2576 = vmatpush1.bf16.msra.mxu1 %v4965_v49  ;;  %v5063_v48 = vld [vmem:[#allocation8 + $0xc] ss:$16 sps:$4 sm:$0xff]   ;;  %v5058_v49 = vld [vmem:[#allocation8] ss:$16 sps:$4 sm:$0xff]  }
 0x206   :  { %2521 = vmatprep.mubr.bf16.mxu0 %v1655_v47  ;;  %2607 = vmatprep.mubr.bf16.mxu1 %v1655_v47  ;;  %v5060_v47 = vld [vmem:[#allocation8 + $0x4] ss:$16 sps:$4 sm:$0xff]  }
 0x207   :  { %2491 = vmatprep.subr.bf16.mxu0 %v4970_v50  ;;  %2577 = vmatprep.subr.bf16.mxu1 %v4973_v51  ;;  %v5061_v50 = vld [vmem:[#allocation8 + $0x8] ss:$16 sps:$4 sm:$0xff]   ;;  %v5066_v51 = vld [vmem:[#allocation8 + $0x24] ss:$16 sps:$4 sm:$0xff]  }
 0x209   :  { %2492 = vmatpush1.bf16.msra.mxu0 %v4968_v52  ;;  %2578 = vmatpush1.bf16.msra.mxu1 %v4971_v53  ;;  %v5069_v52 = vld [vmem:[#allocation8 + $0x2c] ss:$16 sps:$4 sm:$0xff]   ;;  %v5064_v53 = vld [vmem:[#allocation8 + $0x20] ss:$16 sps:$4 sm:$0xff]  }
 0x20a   :  { %2493 = vmatprep.subr.bf16.mxu0 %v4976_v54  ;;  %2579 = vmatprep.subr.bf16.mxu1 %v4979_v55  ;;  %v5067_v54 = vld [vmem:[#allocation8 + $0x28] ss:$16 sps:$4 sm:$0xff]   ;;  %v5072_v55 = vld [vmem:[#allocation8 + $0x44] ss:$16 sps:$4 sm:$0xff]  }
 0x20d   :  { %2494 = vmatpush1.bf16.msra.mxu0 %v4974_v56  ;;  %2580 = vmatpush1.bf16.msra.mxu1 %v4977_v57  ;;  %v5075_v56 = vld [vmem:[#allocation8 + $0x4c] ss:$16 sps:$4 sm:$0xff]   ;;  %v5070_v57 = vld [vmem:[#allocation8 + $0x40] ss:$16 sps:$4 sm:$0xff]  }
 0x20e   :  { %2495 = vmatprep.subr.bf16.mxu0 %v4982_v58  ;;  %2581 = vmatprep.subr.bf16.mxu1 %v4985_v59  ;;  %v5073_v58 = vld [vmem:[#allocation8 + $0x48] ss:$16 sps:$4 sm:$0xff]   ;;  %v5078_v59 = vld [vmem:[#allocation8 + $0x64] ss:$16 sps:$4 sm:$0xff]  }
 0x211   :  { %2496 = vmatpush1.bf16.msra.mxu0 %v4980_v60  ;;  %2582 = vmatpush1.bf16.msra.mxu1 %v4983_v61  ;;  %v5081_v60 = vld [vmem:[#allocation8 + $0x6c] ss:$16 sps:$4 sm:$0xff]   ;;  %v5076_v61 = vld [vmem:[#allocation8 + $0x60] ss:$16 sps:$4 sm:$0xff]  }
 0x212   :  { %2497 = vmatprep.subr.bf16.mxu0 %v4988_v62  ;;  %2583 = vmatprep.subr.bf16.mxu1 %v4991_v63  ;;  %v5084_v62 = vld [vmem:[#allocation8 + $0x84] ss:$16 sps:$4 sm:$0xff]   ;;  %v5087_v63 = vld [vmem:[#allocation8 + $0x8c] ss:$16 sps:$4 sm:$0xff]  }
 0x215   :  { %2498 = vmatpush1.bf16.msra.mxu0 %v4986_v0  ;;  %2584 = vmatpush1.bf16.msra.mxu1 %v4989_v1  ;;  %v5082_v0 = vld [vmem:[#allocation8 + $0x80] ss:$16 sps:$4 sm:$0xff]   ;;  %v5085_v1 = vld [vmem:[#allocation8 + $0x88] ss:$16 sps:$4 sm:$0xff]  }
 0x216   :  { %2499 = vmatprep.subr.bf16.mxu0 %v4994_v2  ;;  %2585 = vmatprep.subr.bf16.mxu1 %v4997_v3  ;;  %v5090_v2 = vld [vmem:[#allocation8 + $0xa4] ss:$16 sps:$4 sm:$0xff]   ;;  %v5093_v3 = vld [vmem:[#allocation8 + $0xac] ss:$16 sps:$4 sm:$0xff]  }
 0x219   :  { %2500 = vmatpush1.bf16.msra.mxu0 %v4992_v4  ;;  %2586 = vmatpush1.bf16.msra.mxu1 %v4995_v5  ;;  %v5088_v4 = vld [vmem:[#allocation8 + $0xa0] ss:$16 sps:$4 sm:$0xff]   ;;  %v5091_v5 = vld [vmem:[#allocation8 + $0xa8] ss:$16 sps:$4 sm:$0xff]  }
 0x21a   :  { %2501 = vmatprep.subr.bf16.mxu0 %v5000_v6  ;;  %2587 = vmatprep.subr.bf16.mxu1 %v5003_v7  ;;  %v5096_v6 = vld [vmem:[#allocation8 + $0xc4] ss:$16 sps:$4 sm:$0xff]   ;;  %v5099_v7 = vld [vmem:[#allocation8 + $0xcc] ss:$16 sps:$4 sm:$0xff]  }
 0x21d   :  { %2502 = vmatpush1.bf16.msra.mxu0 %v4998_v8  ;;  %2588 = vmatpush1.bf16.msra.mxu1 %v5001_v9  ;;  %v5094_v8 = vld [vmem:[#allocation8 + $0xc0] ss:$16 sps:$4 sm:$0xff]   ;;  %v5097_v9 = vld [vmem:[#allocation8 + $0xc8] ss:$16 sps:$4 sm:$0xff]  }
 0x21e   :  { %2503 = vmatprep.subr.bf16.mxu0 %v5006_v10  ;;  %2589 = vmatprep.subr.bf16.mxu1 %v5009_v11  ;;  %v5102_v10 = vld [vmem:[#allocation8 + $0xe4] ss:$16 sps:$4 sm:$0xff]   ;;  %v5105_v11 = vld [vmem:[#allocation8 + $0xec] ss:$16 sps:$4 sm:$0xff]  }
 0x221   :  { %2504 = vmatpush1.bf16.msra.mxu0 %v5004_v12  ;;  %2590 = vmatpush1.bf16.msra.mxu1 %v5007_v13  ;;  %v5100_v12 = vld [vmem:[#allocation8 + $0xe0] ss:$16 sps:$4 sm:$0xff]   ;;  %v5103_v13 = vld [vmem:[#allocation8 + $0xe8] ss:$16 sps:$4 sm:$0xff]  }
 0x222   :  { %2505 = vmatprep.subr.bf16.mxu0 %v5012_v14  ;;  %2591 = vmatprep.subr.bf16.mxu1 %v5015_v15  ;;  %v5108_v14 = vld [vmem:[#allocation8 + $0x104] ss:$16 sps:$4 sm:$0xff]   ;;  %v5111_v15 = vld [vmem:[#allocation8 + $0x10c] ss:$16 sps:$4 sm:$0xff]  }
 0x225   :  { %2506 = vmatpush1.bf16.msra.mxu0 %v5010_v16  ;;  %2592 = vmatpush1.bf16.msra.mxu1 %v5013_v17  ;;  %v5106_v16 = vld [vmem:[#allocation8 + $0x100] ss:$16 sps:$4 sm:$0xff]   ;;  %v5109_v17 = vld [vmem:[#allocation8 + $0x108] ss:$16 sps:$4 sm:$0xff]  }
 0x226   :  { %2507 = vmatprep.subr.bf16.mxu0 %v5018_v18  ;;  %2593 = vmatprep.subr.bf16.mxu1 %v5021_v19  ;;  %v5114_v18 = vld [vmem:[#allocation8 + $0x124] ss:$16 sps:$4 sm:$0xff]   ;;  %v5117_v19 = vld [vmem:[#allocation8 + $0x12c] ss:$16 sps:$4 sm:$0xff]  }
 0x229   :  { %2508 = vmatpush1.bf16.msra.mxu0 %v5016_v20  ;;  %2594 = vmatpush1.bf16.msra.mxu1 %v5019_v21  ;;  %v5112_v20 = vld [vmem:[#allocation8 + $0x120] ss:$16 sps:$4 sm:$0xff]   ;;  %v5115_v21 = vld [vmem:[#allocation8 + $0x128] ss:$16 sps:$4 sm:$0xff]  }
 0x22a   :  { %2509 = vmatprep.subr.bf16.mxu0 %v5024_v22  ;;  %2595 = vmatprep.subr.bf16.mxu1 %v5027_v23  ;;  %v5120_v22 = vld [vmem:[#allocation8 + $0x144] ss:$16 sps:$4 sm:$0xff]   ;;  %v5123_v23 = vld [vmem:[#allocation8 + $0x14c] ss:$16 sps:$4 sm:$0xff]  }
 0x22d   :  { %2510 = vmatpush1.bf16.msra.mxu0 %v5022_v24  ;;  %2596 = vmatpush1.bf16.msra.mxu1 %v5025_v25  ;;  %v5118_v24 = vld [vmem:[#allocation8 + $0x140] ss:$16 sps:$4 sm:$0xff]   ;;  %v5121_v25 = vld [vmem:[#allocation8 + $0x148] ss:$16 sps:$4 sm:$0xff]  }
 0x22e   :  { %2511 = vmatprep.subr.bf16.mxu0 %v5030_v26  ;;  %2597 = vmatprep.subr.bf16.mxu1 %v5033_v27  ;;  %v5126_v26 = vld [vmem:[#allocation8 + $0x164] ss:$16 sps:$4 sm:$0xff]   ;;  %v5129_v27 = vld [vmem:[#allocation8 + $0x16c] ss:$16 sps:$4 sm:$0xff]  }
 0x231   :  { %2512 = vmatpush1.bf16.msra.mxu0 %v5028_v28  ;;  %2598 = vmatpush1.bf16.msra.mxu1 %v5031_v29  ;;  %v5124_v28 = vld [vmem:[#allocation8 + $0x160] ss:$16 sps:$4 sm:$0xff]   ;;  %v5127_v29 = vld [vmem:[#allocation8 + $0x168] ss:$16 sps:$4 sm:$0xff]  }
 0x232   :  { %2513 = vmatprep.subr.bf16.mxu0 %v5036_v30  ;;  %2599 = vmatprep.subr.bf16.mxu1 %v5039_v31  ;;  %v5132_v30 = vld [vmem:[#allocation8 + $0x184] ss:$16 sps:$4 sm:$0xff]   ;;  %v5135_v31 = vld [vmem:[#allocation8 + $0x18c] ss:$16 sps:$4 sm:$0xff]  }
 0x235   :  { %2514 = vmatpush1.bf16.msra.mxu0 %v5034_v32  ;;  %2600 = vmatpush1.bf16.msra.mxu1 %v5037_v33  ;;  %v5130_v32 = vld [vmem:[#allocation8 + $0x180] ss:$16 sps:$4 sm:$0xff]   ;;  %v5133_v33 = vld [vmem:[#allocation8 + $0x188] ss:$16 sps:$4 sm:$0xff]  }
 0x236   :  { %2515 = vmatprep.subr.bf16.mxu0 %v5042_v34  ;;  %2601 = vmatprep.subr.bf16.mxu1 %v5045_v35  ;;  %v5138_v34 = vld [vmem:[#allocation8 + $0x1a4] ss:$16 sps:$4 sm:$0xff]   ;;  %v5141_v35 = vld [vmem:[#allocation8 + $0x1ac] ss:$16 sps:$4 sm:$0xff]  }
 0x239   :  { %2516 = vmatpush1.bf16.msra.mxu0 %v5040_v36  ;;  %2602 = vmatpush1.bf16.msra.mxu1 %v5043_v37  ;;  %v5136_v36 = vld [vmem:[#allocation8 + $0x1a0] ss:$16 sps:$4 sm:$0xff]   ;;  %v5139_v37 = vld [vmem:[#allocation8 + $0x1a8] ss:$16 sps:$4 sm:$0xff]  }
 0x23a   :  { %2517 = vmatprep.subr.bf16.mxu0 %v5048_v38  ;;  %2603 = vmatprep.subr.bf16.mxu1 %v5051_v39  ;;  %v5144_v38 = vld [vmem:[#allocation8 + $0x1c4] ss:$16 sps:$4 sm:$0xff]   ;;  %v5147_v39 = vld [vmem:[#allocation8 + $0x1cc] ss:$16 sps:$4 sm:$0xff]  }
 0x23d   :  { %2518 = vmatpush1.bf16.msra.mxu0 %v5046_v40  ;;  %2604 = vmatpush1.bf16.msra.mxu1 %v5049_v41  ;;  %v5142_v40 = vld [vmem:[#allocation8 + $0x1c0] ss:$16 sps:$4 sm:$0xff]   ;;  %v5145_v41 = vld [vmem:[#allocation8 + $0x1c8] ss:$16 sps:$4 sm:$0xff]  }
 0x23e   :  { %2519 = vmatprep.subr.bf16.mxu0 %v5054_v42  ;;  %2605 = vmatprep.subr.bf16.mxu1 %v5057_v43  ;;  %v5150_v42 = vld [vmem:[#allocation8 + $0x1e4] ss:$16 sps:$4 sm:$0xff]   ;;  %v5153_v43 = vld [vmem:[#allocation8 + $0x1ec] ss:$16 sps:$4 sm:$0xff]  }
 0x241   :  { %2520 = vmatpush1.bf16.msra.mxu0 %v5052_v44  ;;  %2606 = vmatpush1.bf16.msra.mxu1 %v5055_v46  ;;  %v5148_v44 = vld [vmem:[#allocation8 + $0x1e0] ss:$16 sps:$4 sm:$0xff]   ;;  %v5151_v46 = vld [vmem:[#allocation8 + $0x1e8] ss:$16 sps:$4 sm:$0xff]  }
 0x242   :  { %3420 = vmatprep.subr.bf16.mxu0 %v5060_v47  ;;  %3506 = vmatprep.subr.bf16.mxu1 %v5063_v48  ;;  %v5156_v47 = vld [vmem:[#allocation8 + $0x204] ss:$16 sps:$4 sm:$0xff]   ;;  %v5159_v48 = vld [vmem:[#allocation8 + $0x20c] ss:$16 sps:$4 sm:$0xff]  }
 0x244   :  { %2522 = vmatmul.mubr.bf16.vlgmr.msra.gmra.mrb[4].mxu0 %v5551_v45  ;;  %2608 = vmatmul.mubr.bf16.vlgmr.msra.gmra.mrb[4].mxu1 %v5551_v45  ;;  %v5079_v45 = vld [vmem:[#allocation8 + $0x68] ss:$16 sps:$4 sm:$0xff]  }
 0x245   :  { %3421 = vmatpush1.bf16.msra.mxu0 %v5058_v49  ;;  %3507 = vmatpush1.bf16.msra.mxu1 %v5061_v50  ;;  %v1786_v49 = vlaneseq }
 0x246   :  { %3422 = vmatprep.subr.bf16.mxu0 %v5066_v51  ;;  %3508 = vmatprep.subr.bf16.mxu1 %v5069_v52 }
 0x247   :  { %v5555_v50 = vshrl.u32 %v1786_v49, 7  ;;  %v5193_v49 = vld [vmem:[#allocation8 + $0x2c8] ss:$16 sps:$4 sm:$0xff]  }
 0x249   :  { %3423 = vmatpush1.bf16.msra.mxu0 %v5064_v53  ;;  %3509 = vmatpush1.bf16.msra.mxu1 %v5067_v54  ;;  %v1788_v51 = vsub.s32 0, %v5555_v50  ;;  %v1796_v52 = vsub.s32 2, %v5555_v50  ;;  %v1784_v53 = vld [vmem:[%s5605_s3] sm:$0xf]  ;;  %v1792_v54 = vsub.s32 1, %v5555_v50 }
 0x24a   :  { %3424 = vmatprep.subr.bf16.mxu0 %v5072_v55  ;;  %3510 = vmatprep.subr.bf16.mxu1 %v5075_v56  ;;  %v1800_v55 = vsub.s32 3, %v5555_v50 }
 0x24b   :  { %v1789_v56 = vrot.slane %v1784_v53, %v1788_v51 }
 0x24d   :  { %3425 = vmatpush1.bf16.msra.mxu0 %v5070_v57  ;;  %3511 = vmatpush1.bf16.msra.mxu1 %v5073_v58  ;;  %v1797_v57 = vrot.slane %v1784_v53, %v1796_v52  ;;  %v1793_v58 = vrot.slane %v1784_v53, %v1792_v54 }
 0x24e   :  { %3426 = vmatprep.subr.bf16.mxu0 %v5078_v59  ;;  %3512 = vmatprep.subr.bf16.mxu1 %v5081_v60  ;;  %v1801_v59 = vrot.slane %v1784_v53, %v1800_v55  ;;  %v5198_v53 = vld [vmem:[#allocation8 + $0x2e4] ss:$16 sps:$4 sm:$0xff]  }
 0x251   :  { %3427 = vmatpush1.bf16.msra.mxu0 %v5076_v61  ;;  %3513 = vmatpush1.bf16.msra.mxu1 %v5079_v45 }
 0x252   :  { %3428 = vmatprep.subr.bf16.mxu0 %v5084_v62  ;;  %3514 = vmatprep.subr.bf16.mxu1 %v5087_v63 }
 0x255   :  { %3429 = vmatpush1.bf16.msra.mxu0 %v5082_v0  ;;  %3515 = vmatpush1.bf16.msra.mxu1 %v5085_v1 }
 0x256   :  { %3430 = vmatprep.subr.bf16.mxu0 %v5090_v2  ;;  %3516 = vmatprep.subr.bf16.mxu1 %v5093_v3 }
 0x259   :  { %3431 = vmatpush1.bf16.msra.mxu0 %v5088_v4  ;;  %3517 = vmatpush1.bf16.msra.mxu1 %v5091_v5 }
 0x25a   :  { %3432 = vmatprep.subr.bf16.mxu0 %v5096_v6  ;;  %3518 = vmatprep.subr.bf16.mxu1 %v5099_v7 }
 0x25d   :  { %3433 = vmatpush1.bf16.msra.mxu0 %v5094_v8  ;;  %3519 = vmatpush1.bf16.msra.mxu1 %v5097_v9 }
 0x25e   :  { %3434 = vmatprep.subr.bf16.mxu0 %v5102_v10  ;;  %3520 = vmatprep.subr.bf16.mxu1 %v5105_v11 }
 0x261   :  { %3435 = vmatpush1.bf16.msra.mxu0 %v5100_v12  ;;  %3521 = vmatpush1.bf16.msra.mxu1 %v5103_v13 }
 0x262   :  { %3436 = vmatprep.subr.bf16.mxu0 %v5108_v14  ;;  %3522 = vmatprep.subr.bf16.mxu1 %v5111_v15 }
 0x265   :  { %3437 = vmatpush1.bf16.msra.mxu0 %v5106_v16  ;;  %3523 = vmatpush1.bf16.msra.mxu1 %v5109_v17 }
 0x266   :  { %3438 = vmatprep.subr.bf16.mxu0 %v5114_v18  ;;  %3524 = vmatprep.subr.bf16.mxu1 %v5117_v19 }
 0x269   :  { %3439 = vmatpush1.bf16.msra.mxu0 %v5112_v20  ;;  %3525 = vmatpush1.bf16.msra.mxu1 %v5115_v21 }
 0x26a   :  { %3440 = vmatprep.subr.bf16.mxu0 %v5120_v22  ;;  %3526 = vmatprep.subr.bf16.mxu1 %v5123_v23  ;;  %v5154_v23 = vld [vmem:[#allocation8 + $0x200] ss:$16 sps:$4 sm:$0xff]  }
 0x26d   :  { %3441 = vmatpush1.bf16.msra.mxu0 %v5118_v24  ;;  %3527 = vmatpush1.bf16.msra.mxu1 %v5121_v25  ;;  %v5157_v24 = vld [vmem:[#allocation8 + $0x208] ss:$16 sps:$4 sm:$0xff]   ;;  %v5162_v25 = vld [vmem:[#allocation8 + $0x224] ss:$16 sps:$4 sm:$0xff]  }
 0x26e   :  { %3442 = vmatprep.subr.bf16.mxu0 %v5126_v26  ;;  %3528 = vmatprep.subr.bf16.mxu1 %v5129_v27  ;;  %v5165_v26 = vld [vmem:[#allocation8 + $0x22c] ss:$16 sps:$4 sm:$0xff]   ;;  %v5160_v27 = vld [vmem:[#allocation8 + $0x220] ss:$16 sps:$4 sm:$0xff]  }
 0x271   :  { %3443 = vmatpush1.bf16.msra.mxu0 %v5124_v28  ;;  %3529 = vmatpush1.bf16.msra.mxu1 %v5127_v29  ;;  %v5163_v28 = vld [vmem:[#allocation8 + $0x228] ss:$16 sps:$4 sm:$0xff]   ;;  %v5168_v29 = vld [vmem:[#allocation8 + $0x244] ss:$16 sps:$4 sm:$0xff]  }
 0x272   :  { %3444 = vmatprep.subr.bf16.mxu0 %v5132_v30  ;;  %3530 = vmatprep.subr.bf16.mxu1 %v5135_v31  ;;  %v5171_v30 = vld [vmem:[#allocation8 + $0x24c] ss:$16 sps:$4 sm:$0xff]   ;;  %v5166_v31 = vld [vmem:[#allocation8 + $0x240] ss:$16 sps:$4 sm:$0xff]  }
 0x275   :  { %3445 = vmatpush1.bf16.msra.mxu0 %v5130_v32  ;;  %3531 = vmatpush1.bf16.msra.mxu1 %v5133_v33  ;;  %v5169_v32 = vld [vmem:[#allocation8 + $0x248] ss:$16 sps:$4 sm:$0xff]   ;;  %v5174_v33 = vld [vmem:[#allocation8 + $0x264] ss:$16 sps:$4 sm:$0xff]  }
 0x276   :  { %3446 = vmatprep.subr.bf16.mxu0 %v5138_v34  ;;  %3532 = vmatprep.subr.bf16.mxu1 %v5141_v35  ;;  %v5177_v34 = vld [vmem:[#allocation8 + $0x26c] ss:$16 sps:$4 sm:$0xff]   ;;  %v5172_v35 = vld [vmem:[#allocation8 + $0x260] ss:$16 sps:$4 sm:$0xff]  }
 0x279   :  { %3447 = vmatpush1.bf16.msra.mxu0 %v5136_v36  ;;  %3533 = vmatpush1.bf16.msra.mxu1 %v5139_v37  ;;  %v5175_v36 = vld [vmem:[#allocation8 + $0x268] ss:$16 sps:$4 sm:$0xff]   ;;  %v5180_v37 = vld [vmem:[#allocation8 + $0x284] ss:$16 sps:$4 sm:$0xff]  }
 0x27a   :  { %3448 = vmatprep.subr.bf16.mxu0 %v5144_v38  ;;  %3534 = vmatprep.subr.bf16.mxu1 %v5147_v39  ;;  %v5183_v38 = vld [vmem:[#allocation8 + $0x28c] ss:$16 sps:$4 sm:$0xff]   ;;  %v5178_v39 = vld [vmem:[#allocation8 + $0x280] ss:$16 sps:$4 sm:$0xff]  }
 0x27d   :  { %3449 = vmatpush1.bf16.msra.mxu0 %v5142_v40  ;;  %3535 = vmatpush1.bf16.msra.mxu1 %v5145_v41  ;;  %v5181_v40 = vld [vmem:[#allocation8 + $0x288] ss:$16 sps:$4 sm:$0xff]   ;;  %v5186_v41 = vld [vmem:[#allocation8 + $0x2a4] ss:$16 sps:$4 sm:$0xff]  }
 0x27e   :  { %3450 = vmatprep.subr.bf16.mxu0 %v5150_v42  ;;  %3536 = vmatprep.subr.bf16.mxu1 %v5153_v43  ;;  %v5189_v42 = vld [vmem:[#allocation8 + $0x2ac] ss:$16 sps:$4 sm:$0xff]   ;;  %v5184_v43 = vld [vmem:[#allocation8 + $0x2a0] ss:$16 sps:$4 sm:$0xff]  }
 0x281   :  { %3451 = vmatpush1.bf16.msra.mxu0 %v5148_v44  ;;  %3537 = vmatpush1.bf16.msra.mxu1 %v5151_v46  ;;  %v5187_v44 = vld [vmem:[#allocation8 + $0x2a8] ss:$16 sps:$4 sm:$0xff]   ;;  %v5192_v46 = vld [vmem:[#allocation8 + $0x2c4] ss:$16 sps:$4 sm:$0xff]  }
 0x282   :  { %3463 = vmatprep.subr.bf16.mxu0 %v5156_v47  ;;  %3549 = vmatprep.subr.bf16.mxu1 %v5159_v48  ;;  %v5195_v47 = vld [vmem:[#allocation8 + $0x2cc] ss:$16 sps:$4 sm:$0xff]   ;;  %v5190_v48 = vld [vmem:[#allocation8 + $0x2c0] ss:$16 sps:$4 sm:$0xff]  }
 0x317   :  { %v2523_v60 = vpop.f32.mrb[4].mxu0  ;;  %v2609_v61 = vpop.f32.mrb[4].mxu1 }
 0x318   :  { %v4501_v45 = vadd.f32 %v2523_v60, %v1789_v56  ;;  %v4505_v62 = vadd.f32 %v2609_v61, %v1797_v57  ;;  %v2525_v63 = vpop.f32.mrb[5].mxu0  ;;  %v2611_v0 = vpop.f32.mrb[5].mxu1  ;;  %v5207_v60 = vld [vmem:[#allocation8 + $0x30c] ss:$16 sps:$4 sm:$0xff]   ;;  %v5202_v61 = vld [vmem:[#allocation8 + $0x300] ss:$16 sps:$4 sm:$0xff]  }
 0x319   :  { %v4502_v1 = vadd.f32 %v2525_v63, %v1793_v58  ;;  %v4506_v2 = vadd.f32 %v2611_v0, %v1801_v59  ;;  %v2527_v3 = vpop.f32.mrb[6].mxu0  ;;  %v2613_v4 = vpop.f32.mrb[6].mxu1  ;;  %v5213_v63 = vld [vmem:[#allocation8 + $0x32c] ss:$16 sps:$4 sm:$0xff]   ;;  %v5208_v0 = vld [vmem:[#allocation8 + $0x320] ss:$16 sps:$4 sm:$0xff]  }
 0x31a   :  { %v4503_v5 = vadd.f32 %v2527_v3, %v1789_v56  ;;  %v4507_v6 = vadd.f32 %v2613_v4, %v1797_v57  ;;  %v2529_v7 = vpop.f32.mrb[7].mxu0  ;;  %v2615_v8 = vpop.f32.mrb[7].mxu1  ;;  %v2618_v11 = vmax.f32 %v4501_v45, 0.0  ;;  %v2620_v12 = vmax.f32 %v4505_v62, 0.0  ;;  %v5201_v56 = vld [vmem:[#allocation8 + $0x2ec] ss:$16 sps:$4 sm:$0xff]  }
 0x31b   :  { %v4504_v9 = vadd.f32 %v2529_v7, %v1793_v58  ;;  %v4508_v10 = vadd.f32 %v2615_v8, %v1801_v59  ;;  %v2619_v15 = vmax.f32 %v4502_v1, 0.0  ;;  %v2621_v16 = vmax.f32 %v4506_v2, 0.0  ;;  %v5196_v57 = vld [vmem:[#allocation8 + $0x2e0] ss:$16 sps:$4 sm:$0xff]   ;;  %v5199_v58 = vld [vmem:[#allocation8 + $0x2e8] ss:$16 sps:$4 sm:$0xff]  }
 0x31c   :  { %v2622_v13 = vmax.f32 %v4503_v5, 0.0  ;;  %v2624_v14 = vmax.f32 %v4507_v6, 0.0  ;;  %v5204_v59 = vld [vmem:[#allocation8 + $0x304] ss:$16 sps:$4 sm:$0xff]   ;;  %v5205_v45 = vld [vmem:[#allocation8 + $0x308] ss:$16 sps:$4 sm:$0xff]  }
 0x31d   :  { %v2623_v17 = vmax.f32 %v4504_v9, 0.0  ;;  %v2625_v18 = vmax.f32 %v4508_v10, 0.0  ;;  %v5210_v62 = vld [vmem:[#allocation8 + $0x324] ss:$16 sps:$4 sm:$0xff]   ;;  %v5211_v1 = vld [vmem:[#allocation8 + $0x328] ss:$16 sps:$4 sm:$0xff]  }
 0x31e   :  { %v2626_v19 = vpack.c.bf16 %v2622_v13, %v2618_v11  ;;  %v5572_v20 = vpack.c.bf16 %v2624_v14, %v2620_v12  ;;  %v5216_v2 = vld [vmem:[#allocation8 + $0x344] ss:$16 sps:$4 sm:$0xff]   ;;  %v5219_v3 = vld [vmem:[#allocation8 + $0x34c] ss:$16 sps:$4 sm:$0xff]   ;;  %v5214_v4 = vld [vmem:[#allocation8 + $0x340] ss:$16 sps:$4 sm:$0xff]  }
 0x31f   :  { %v2627_v21 = vpack.c.bf16 %v2623_v17, %v2619_v15  ;;  %v2629_v22 = vpack.c.bf16 %v2625_v18, %v2621_v16  ;;  %v5217_v5 = vld [vmem:[#allocation8 + $0x348] ss:$16 sps:$4 sm:$0xff]   ;;  %v5222_v6 = vld [vmem:[#allocation8 + $0x364] ss:$16 sps:$4 sm:$0xff]   ;;  %v5225_v7 = vld [vmem:[#allocation8 + $0x36c] ss:$16 sps:$4 sm:$0xff]  }
 0x320   :  { %v5220_v8 = vld [vmem:[#allocation8 + $0x360] ss:$16 sps:$4 sm:$0xff]   ;;  %v5223_v9 = vld [vmem:[#allocation8 + $0x368] ss:$16 sps:$4 sm:$0xff]   ;;  %v5228_v10 = vld [vmem:[#allocation8 + $0x384] ss:$16 sps:$4 sm:$0xff]  }
 0x321   :  { %3452 = vmatprep.mubr.bf16.mxu0 %v2627_v21  ;;  %3538 = vmatprep.mubr.bf16.mxu1 %v2627_v21  ;;  %v5231_v11 = vld [vmem:[#allocation8 + $0x38c] ss:$16 sps:$4 sm:$0xff]   ;;  %v5226_v12 = vld [vmem:[#allocation8 + $0x380] ss:$16 sps:$4 sm:$0xff]   ;;  %v5229_v13 = vld [vmem:[#allocation8 + $0x388] ss:$16 sps:$4 sm:$0xff]  }
 0x322   :  { %3453 = vmatmul.mubr.bf16.vlgmr.msra.gmra.mrb[8].mxu0 %v2626_v19  ;;  %3539 = vmatmul.mubr.bf16.vlgmr.msra.gmra.mrb[8].mxu1 %v2626_v19  ;;  %v5234_v14 = vld [vmem:[#allocation8 + $0x3a4] ss:$16 sps:$4 sm:$0xff]   ;;  %v5237_v15 = vld [vmem:[#allocation8 + $0x3ac] ss:$16 sps:$4 sm:$0xff]   ;;  %v5232_v16 = vld [vmem:[#allocation8 + $0x3a0] ss:$16 sps:$4 sm:$0xff]  }
 0x323   :  { %3464 = vmatpush1.bf16.msra.mxu0 %v5154_v23  ;;  %3550 = vmatpush1.bf16.msra.mxu1 %v5157_v24  ;;  %v5235_v17 = vld [vmem:[#allocation8 + $0x3a8] ss:$16 sps:$4 sm:$0xff]   ;;  %v5240_v18 = vld [vmem:[#allocation8 + $0x3c4] ss:$16 sps:$4 sm:$0xff]   ;;  %v5243_v19 = vld [vmem:[#allocation8 + $0x3cc] ss:$16 sps:$4 sm:$0xff]  }
 0x324   :  { %3495 = vmatprep.mubr.bf16.mxu0 %v2629_v22  ;;  %3581 = vmatprep.mubr.bf16.mxu1 %v2629_v22  ;;  %v5238_v21 = vld [vmem:[#allocation8 + $0x3c0] ss:$16 sps:$4 sm:$0xff]   ;;  %v5241_v22 = vld [vmem:[#allocation8 + $0x3c8] ss:$16 sps:$4 sm:$0xff]   ;;  %v5246_v23 = vld [vmem:[#allocation8 + $0x3e4] ss:$16 sps:$4 sm:$0xff]  }
 0x325   :  { %3465 = vmatprep.subr.bf16.mxu0 %v5162_v25  ;;  %3551 = vmatprep.subr.bf16.mxu1 %v5165_v26  ;;  %v5249_v24 = vld [vmem:[#allocation8 + $0x3ec] ss:$16 sps:$4 sm:$0xff]   ;;  %v5244_v25 = vld [vmem:[#allocation8 + $0x3e0] ss:$16 sps:$4 sm:$0xff]   ;;  %v5247_v26 = vld [vmem:[#allocation8 + $0x3e8] ss:$16 sps:$4 sm:$0xff]  }
 0x327   :  { %3466 = vmatpush1.bf16.msra.mxu0 %v5160_v27  ;;  %3552 = vmatpush1.bf16.msra.mxu1 %v5163_v28  ;;  %v5250_v27 = vld [vmem:[#allocation10 + $0x40] sm:$0xff]  }
 0x328   :  { %3467 = vmatprep.subr.bf16.mxu0 %v5168_v29  ;;  %3553 = vmatprep.subr.bf16.mxu1 %v5171_v30  ;;  %v5251_v28 = vld [vmem:[#allocation10 + $0xc0] sm:$0xff]  }
 0x329   :  { %v5252_v29 = vld [vmem:[#allocation10] sm:$0xff]  }
 0x32a   :  { %v5253_v30 = vld [vmem:[#allocation10 + $0x80] sm:$0xff]  }
 0x32b   :  { %3468 = vmatpush1.bf16.msra.mxu0 %v5166_v31  ;;  %3554 = vmatpush1.bf16.msra.mxu1 %v5169_v32  ;;  %v5254_v31 = vld [vmem:[#allocation10 + $0x48] sm:$0xff]  }
 0x32c   :  { %3469 = vmatprep.subr.bf16.mxu0 %v5174_v33  ;;  %3555 = vmatprep.subr.bf16.mxu1 %v5177_v34  ;;  %v5255_v32 = vld [vmem:[#allocation10 + $0xc8] sm:$0xff]  }
 0x32d   :  { %v5256_v33 = vld [vmem:[#allocation10 + $0x8] sm:$0xff]  }
 0x32e   :  { %v5257_v34 = vld [vmem:[#allocation10 + $0x88] sm:$0xff]  }
 0x32f   :  { %3470 = vmatpush1.bf16.msra.mxu0 %v5172_v35  ;;  %3556 = vmatpush1.bf16.msra.mxu1 %v5175_v36  ;;  %v5258_v35 = vld [vmem:[#allocation10 + $0x50] sm:$0xff]  }
 0x330   :  { %3471 = vmatprep.subr.bf16.mxu0 %v5180_v37  ;;  %3557 = vmatprep.subr.bf16.mxu1 %v5183_v38  ;;  %v5259_v36 = vld [vmem:[#allocation10 + $0xd0] sm:$0xff]  }
 0x331   :  { %v5260_v37 = vld [vmem:[#allocation10 + $0x10] sm:$0xff]  }
 0x332   :  { %v5261_v38 = vld [vmem:[#allocation10 + $0x90] sm:$0xff]  }
 0x333   :  { %3472 = vmatpush1.bf16.msra.mxu0 %v5178_v39  ;;  %3558 = vmatpush1.bf16.msra.mxu1 %v5181_v40  ;;  %v5262_v39 = vld [vmem:[#allocation10 + $0x58] sm:$0xff]  }
 0x334   :  { %3473 = vmatprep.subr.bf16.mxu0 %v5186_v41  ;;  %3559 = vmatprep.subr.bf16.mxu1 %v5189_v42  ;;  %v5263_v40 = vld [vmem:[#allocation10 + $0xd8] sm:$0xff]   ;;  %v5266_v42 = vld [vmem:[#allocation10 + $0x60] sm:$0xff]  }
 0x335   :  { %v5264_v41 = vld [vmem:[#allocation10 + $0x18] sm:$0xff]  }
 0x337   :  { %3474 = vmatpush1.bf16.msra.mxu0 %v5184_v43  ;;  %3560 = vmatpush1.bf16.msra.mxu1 %v5187_v44  ;;  %v5267_v43 = vld [vmem:[#allocation10 + $0xe0] sm:$0xff]  }
 0x338   :  { %3475 = vmatprep.subr.bf16.mxu0 %v5192_v46  ;;  %3561 = vmatprep.subr.bf16.mxu1 %v5195_v47  ;;  %v5268_v44 = vld [vmem:[#allocation10 + $0x20] sm:$0xff]   ;;  %v5270_v47 = vld [vmem:[#allocation10 + $0x68] sm:$0xff]  }
 0x339   :  { %v5269_v46 = vld [vmem:[#allocation10 + $0xa0] sm:$0xff]  }
 0x33b   :  { %3476 = vmatpush1.bf16.msra.mxu0 %v5190_v48  ;;  %3562 = vmatpush1.bf16.msra.mxu1 %v5193_v49  ;;  %v5271_v48 = vld [vmem:[#allocation10 + $0xe8] sm:$0xff]  }
 0x33c   :  { %3477 = vmatprep.subr.bf16.mxu0 %v5198_v53  ;;  %3563 = vmatprep.subr.bf16.mxu1 %v5201_v56  ;;  %v5272_v49 = vld [vmem:[#allocation10 + $0x28] sm:$0xff]   ;;  %v5274_v56 = vld [vmem:[#allocation10 + $0x70] sm:$0xff]  }
 0x33d   :  { %v5273_v53 = vld [vmem:[#allocation10 + $0xa8] sm:$0xff]  }
 0x33f   :  { %3478 = vmatpush1.bf16.msra.mxu0 %v5196_v57  ;;  %3564 = vmatpush1.bf16.msra.mxu1 %v5199_v58  ;;  %v5275_v57 = vld [vmem:[#allocation10 + $0xf0] sm:$0xff]  }
 0x340   :  { %3479 = vmatprep.subr.bf16.mxu0 %v5204_v59  ;;  %3565 = vmatprep.subr.bf16.mxu1 %v5207_v60  ;;  %v5276_v58 = vld [vmem:[#allocation10 + $0x30] sm:$0xff]   ;;  %v5278_v60 = vld [vmem:[#allocation10 + $0x78] sm:$0xff]  }
 0x341   :  { %v5277_v59 = vld [vmem:[#allocation10 + $0xb0] sm:$0xff]  }
 0x343   :  { %3480 = vmatpush1.bf16.msra.mxu0 %v5202_v61  ;;  %3566 = vmatpush1.bf16.msra.mxu1 %v5205_v45  ;;  %v5279_v61 = vld [vmem:[#allocation10 + $0xf8] sm:$0xff]  }
 0x344   :  { %3481 = vmatprep.subr.bf16.mxu0 %v5210_v62  ;;  %3567 = vmatprep.subr.bf16.mxu1 %v5213_v63  ;;  %v5280_v45 = vld [vmem:[#allocation10 + $0x38] sm:$0xff]   ;;  %v2758_v63 = vld [vmem:[%s5607_s5] sm:$0xf] }
 0x345   :  { %v5281_v62 = vld [vmem:[#allocation10 + $0xb8] sm:$0xff]  }
 0x347   :  { %3482 = vmatpush1.bf16.msra.mxu0 %v5208_v0  ;;  %3568 = vmatpush1.bf16.msra.mxu1 %v5211_v1  ;;  %v2763_v0 = vrot.slane %v2758_v63, %v1788_v51  ;;  %v2771_v1 = vrot.slane %v2758_v63, %v1796_v52 }
 0x348   :  { %3483 = vmatprep.subr.bf16.mxu0 %v5216_v2  ;;  %3569 = vmatprep.subr.bf16.mxu1 %v5219_v3  ;;  %v2767_v2 = vrot.slane %v2758_v63, %v1792_v54  ;;  %v2775_v3 = vrot.slane %v2758_v63, %v1800_v55 }
 0x34b   :  { %3484 = vmatpush1.bf16.msra.mxu0 %v5214_v4  ;;  %3570 = vmatpush1.bf16.msra.mxu1 %v5217_v5 }
 0x34c   :  { %3485 = vmatprep.subr.bf16.mxu0 %v5222_v6  ;;  %3571 = vmatprep.subr.bf16.mxu1 %v5225_v7 }
 0x34f   :  { %3486 = vmatpush1.bf16.msra.mxu0 %v5220_v8  ;;  %3572 = vmatpush1.bf16.msra.mxu1 %v5223_v9 }
 0x350   :  { %3487 = vmatprep.subr.bf16.mxu0 %v5228_v10  ;;  %3573 = vmatprep.subr.bf16.mxu1 %v5231_v11 }
 0x353   :  { %3488 = vmatpush1.bf16.msra.mxu0 %v5226_v12  ;;  %3574 = vmatpush1.bf16.msra.mxu1 %v5229_v13 }
 0x354   :  { %3489 = vmatprep.subr.bf16.mxu0 %v5234_v14  ;;  %3575 = vmatprep.subr.bf16.mxu1 %v5237_v15 }
 0x357   :  { %3490 = vmatpush1.bf16.msra.mxu0 %v5232_v16  ;;  %3576 = vmatpush1.bf16.msra.mxu1 %v5235_v17 }
 0x358   :  { %3491 = vmatprep.subr.bf16.mxu0 %v5240_v18  ;;  %3577 = vmatprep.subr.bf16.mxu1 %v5243_v19 }
 0x35b   :  { %3492 = vmatpush1.bf16.msra.mxu0 %v5238_v21  ;;  %3578 = vmatpush1.bf16.msra.mxu1 %v5241_v22 }
 0x35c   :  { %3493 = vmatprep.subr.bf16.mxu0 %v5246_v23  ;;  %3579 = vmatprep.subr.bf16.mxu1 %v5249_v24 }
 0x35f   :  { %3494 = vmatpush1.bf16.msra.mxu0 %v5244_v25  ;;  %3580 = vmatpush1.bf16.msra.mxu1 %v5247_v26 }
 0x360   :  { %4457 = vmatprep.subr.bf16.mxu0 %v5250_v27  ;;  %4479 = vmatprep.subr.bf16.mxu1 %v5251_v28 }
 0x362   :  { %3496 = vmatmul.mubr.bf16.vlgmr.msra.gmra.mrb[8].mxu0 %v5572_v20  ;;  %3582 = vmatmul.mubr.bf16.vlgmr.msra.gmra.mrb[8].mxu1 %v5572_v20  ;;  %v5265_v20 = vld [vmem:[#allocation10 + $0x98] sm:$0xff]  }
 0x363   :  { %4458 = vmatpush3.bf16.msra.mxu0 %v5252_v29  ;;  %4480 = vmatpush3.bf16.msra.mxu1 %v5253_v30  ;;  %v4424_v30 = vld [vmem:[%s5609_s7] ss:$0 sm:$0xff]  ;;  %s5392_s7 = scalar_lea.vmem %s3957_s29, 256 }
 0x364   :  { %4459 = vmatprep.subr.bf16.mxu0 %v5254_v31  ;;  %4481 = vmatprep.subr.bf16.mxu1 %v5255_v32  ;;  %p5393_p12 = scmp.ne.s32.totalorder %s3957_s29, %s5392_s7  ;;  %p5398_p0 = scmp.lt.s32.totalorder %s5392_s7, %s5392_s7 }
 0x366   :  { %p5399_p1 = por %p5398_p0, %p5397_p13 }
 0x367   :  { %4460 = vmatpush3.bf16.msra.mxu0 %v5256_v33  ;;  %4482 = vmatpush3.bf16.msra.mxu1 %v5257_v34 }
 0x368   :  { %4461 = vmatprep.subr.bf16.mxu0 %v5258_v35  ;;  %4483 = vmatprep.subr.bf16.mxu1 %v5259_v36  ;;  %p5400_p2 = pnand %p5399_p1, %p5393_p12 }
 0x36b   :  { %4462 = vmatpush3.bf16.msra.mxu0 %v5260_v37  ;;  %4484 = vmatpush3.bf16.msra.mxu1 %v5261_v38 }
 0x36c   :  { %4463 = vmatprep.subr.bf16.mxu0 %v5262_v39  ;;  %4485 = vmatprep.subr.bf16.mxu1 %v5263_v40 }
 0x36f   :  { %4464 = vmatpush3.bf16.msra.mxu0 %v5264_v41  ;;  %4486 = vmatpush3.bf16.msra.mxu1 %v5265_v20 }
 0x370   :  { %4465 = vmatprep.subr.bf16.mxu0 %v5266_v42  ;;  %4487 = vmatprep.subr.bf16.mxu1 %v5267_v43 }
 0x373   :  { %4466 = vmatpush3.bf16.msra.mxu0 %v5268_v44  ;;  %4488 = vmatpush3.bf16.msra.mxu1 %v5269_v46 }
 0x374   :  { %4467 = vmatprep.subr.bf16.mxu0 %v5270_v47  ;;  %4489 = vmatprep.subr.bf16.mxu1 %v5271_v48 }
 0x377   :  { %4468 = vmatpush3.bf16.msra.mxu0 %v5272_v49  ;;  %4490 = vmatpush3.bf16.msra.mxu1 %v5273_v53 }
 0x378   :  { %4469 = vmatprep.subr.bf16.mxu0 %v5274_v56  ;;  %4491 = vmatprep.subr.bf16.mxu1 %v5275_v57 }
 0x37b   :  { %4470 = vmatpush3.bf16.msra.mxu0 %v5276_v58  ;;  %4492 = vmatpush3.bf16.msra.mxu1 %v5277_v59 }
 0x37c   :  { %4471 = vmatprep.subr.bf16.mxu0 %v5278_v60  ;;  %4493 = vmatprep.subr.bf16.mxu1 %v5279_v61 }
 0x37f   :  { %4472 = vmatpush3.bf16.msra.mxu0 %v5280_v45  ;;  %4494 = vmatpush3.bf16.msra.mxu1 %v5281_v62 }
 0x435   :  { %v3497_v4 = vpop.f32.mrb[8].mxu0  ;;  %v3583_v5 = vpop.f32.mrb[8].mxu1 }
 0x436   :  { %v4509_v6 = vadd.f32 %v3497_v4, %v2763_v0  ;;  %v4513_v7 = vadd.f32 %v3583_v5, %v2771_v1  ;;  %v3499_v8 = vpop.f32.mrb[9].mxu0  ;;  %v3585_v9 = vpop.f32.mrb[9].mxu1 }
 0x437   :  { %v4510_v10 = vadd.f32 %v3499_v8, %v2767_v2  ;;  %v4514_v11 = vadd.f32 %v3585_v9, %v2775_v3  ;;  %v3501_v12 = vpop.f32.mrb[10].mxu0  ;;  %v3587_v13 = vpop.f32.mrb[10].mxu1 }
 0x438   :  { %v4511_v51 = vadd.f32 %v3501_v12, %v2763_v0  ;;  %v4515_v14 = vadd.f32 %v3587_v13, %v2771_v1  ;;  %v3503_v15 = vpop.f32.mrb[11].mxu0  ;;  %v3589_v52 = vpop.f32.mrb[11].mxu1  ;;  %v3592_v54 = vmax.f32 %v4509_v6, 0.0  ;;  %v3594_v18 = vmax.f32 %v4513_v7, 0.0 }
 0x439   :  { %v4512_v16 = vadd.f32 %v3503_v15, %v2767_v2  ;;  %v4516_v17 = vadd.f32 %v3589_v52, %v2775_v3  ;;  %v3593_v19 = vmax.f32 %v4510_v10, 0.0  ;;  %v3595_v21 = vmax.f32 %v4514_v11, 0.0 }
 0x43a   :  { %v3596_v50 = vmax.f32 %v4511_v51, 0.0  ;;  %v3598_v55 = vmax.f32 %v4515_v14, 0.0 }
 0x43b   :  { %v3597_v22 = vmax.f32 %v4512_v16, 0.0  ;;  %v3599_v23 = vmax.f32 %v4516_v17, 0.0 }
 0x43c   :  { %v3600_v24 = vpack.c.bf16 %v3596_v50, %v3592_v54  ;;  %v3602_v25 = vpack.c.bf16 %v3598_v55, %v3594_v18 }
 0x43d   :  { %v3601_v26 = vpack.c.bf16 %v3597_v22, %v3593_v19  ;;  %v3603_v27 = vpack.c.bf16 %v3599_v23, %v3595_v21 }
 0x43f   :  { %3899 = vmatprep.mubr.bf16.mxu0 %v3601_v26  ;;  %3940 = vmatprep.mubr.bf16.mxu1 %v3603_v27 }
 0x440   :  { %3900 = vmatmul.mubr.bf16.vlgmr.msra.gmra.mrb[12].mxu0 %v3600_v24  ;;  %3941 = vmatmul.mubr.bf16.vlgmr.msra.gmra.mrb[12].mxu1 %v3602_v25 }
 0x513   :  { %v4473_v28 = vpop.f32.mrb[12].mxu0  ;;  %v4495_v29 = vpop.f32.mrb[12].mxu1 }
 0x514   :  { %v4474_v31 = vpop.f32.mrb[13].mxu0  ;;  %v4496_v32 = vpop.f32.mrb[13].mxu1 }
 0x515   :  { %v4475_v33 = vadd.f32 %v4474_v31, %v4473_v28  ;;  %v4497_v34 = vadd.f32 %v4496_v32, %v4495_v29  ;;  %v4476_v35 = vpop.f32.mrb[14].mxu0  ;;  %v4498_v36 = vpop.f32.mrb[14].mxu1 }
 0x516   :  { %v4477_v37 = vpop.f32.mrb[15].mxu0  ;;  %v4499_v38 = vpop.f32.mrb[15].mxu1 }
 0x517   :  { %v3902_v39 = vadd.f32 %v4475_v33, %v4424_v30  ;;  %v4478_v40 = vadd.f32 %v4477_v37, %v4476_v35  ;;  %v4500_v41 = vadd.f32 %v4499_v38, %v4498_v36 }
 0x519   :  { %v3943_v20 = vadd.f32 %v4497_v34, %v3902_v39  ;;  %v3905_v42 = vadd.f32 %v4478_v40, %v4424_v30 }
 0x51b   :  { %3949 = vst [vmem:[#allocation11] sm:$0xff] %v3943_v20  ;;  %v3946_v43 = vadd.f32 %v4500_v41, %v3905_v42 }
 0x51d   :  { %3950 = vst [vmem:[#allocation11 + $0x8] sm:$0xff] %v3946_v43 }
 0x51e   :  { %5403 = shalt.err (!%p5400_p2)
}
 0x51f   :  { %s5404_s28 = scalar_lea.hbm %s5610_s8, 256 }
 0x520   :  { %p5405_p3 = scmp.ne.s32.totalorder %s5610_s8, %s5404_s28  ;;  %p5408_p4 = scmp.lt.u32.totalorder %s5404_s28, %s5610_s8 }
 0x522   :  { %p5410_p5 = pnand %p5408_p4, %p5405_p3 }
 0x524   :  { %5413 = shalt.err (!%p5410_p5)
}
 0x525   :  { %s5435_s22 = smov 128   ;;  %s5436_s12 = smov 8  }
 0x526   :  { %3962 = dma.vmem_to_hbm [thread:$0]  %s3957_s29, 256, %s5610_s8, [#allocation4], %s5435_s22, %s5435_s22, %s5436_s12  }
 0x527   :  { %5420 = dma.done.wait [#allocation4], 256  }
 0x528   :  { %5421 = vsyncadd [#allocation4], 4294967040 }
 0x529   :  { %3966 = vsyncpa [#allocation3], 1 }
 0x52a   :  { %3967 = vsyncpa [#allocation6], 1 }
 0x52b   :  { %3968 = vsyncpa [#allocation9], 1 }
 0x52c   :  { %3969 = vsyncpa [#allocation4], 1 }

</bundles_post_ra>
